<compile_context>
chip_gen: v6e
topology: v6e:2x2x1
jax: 0.10.0
libtpu: 0.0.40
codegen_flags: <defaults>
</compile_context>

<pallas_src>
import functools
import math

import jax
import jax.numpy as jnp
from jax import lax
from jax.experimental import pallas as pl
from jax.experimental.pallas import tpu as pltpu


def _round_up(x, m):
    return ((x + m - 1) // m) * m


def _device_defaults():
    """(preferred q_tile, vmem_limit_bytes) per TPU generation."""
    kind = ""
    try:
        kind = jax.devices()[0].device_kind.lower()
    except Exception:
        pass
    if "v6" in kind:
        # 128 MiB VMEM + 256-wide MXU: feed full-height 256-row M tiles.
        return 256, 96 * 1024 * 1024
    if "v5" in kind:
        # 128-wide MXU: M=128 already saturates it; spend VMEM on residency.
        return 128, 96 * 1024 * 1024
    # v7x / unknown: 64 MiB physical VMEM per TensorCore -> tighter budget.
    return 128, 40 * 1024 * 1024


def _layernorm(v, gamma, beta, eps=1e-5):
    # Centered (two-pass) variance: robust when post-residual activations have a
    # large mean relative to their spread.
    mu = jnp.mean(v, axis=-1, keepdims=True)
    d = v - mu
    var = jnp.mean(d * d, axis=-1, keepdims=True)
    return d * lax.rsqrt(var + eps) * gamma + beta


def vit_block_kernel(x_ref, wq_ref, wkv_ref, wo_ref, w1_ref, w2_ref,
                     bkv_ref, bff1_ref, vec_ref,
                     o_ref,
                     k_scr, v_scr, attn_scr,
                     *, num_heads, seq_len, approx_recip):
    S_pad, D = x_ref.shape
    TQ = o_ref.shape[0]
    H = num_heads
    hd = D // H
    cdt = wq_ref.dtype                       # bf16: MXU-native matmul input dtype

    # ---- once per batch element: project K|V for the FULL sequence into a
    #      persistent head-split bf16 scratch (qi axis is "arbitrary"). ----------
    @pl.when(pl.program_id(1) == 0)
    def _fill_kv():
        xa = x_ref[...].astype(cdt)                                     # (S_pad, D)
        kv = jnp.dot(xa, wkv_ref[...], preferred_element_type=jnp.float32)
        kv = (kv + bkv_ref[...]).astype(cdt)                            # (S_pad, 2D)
        for h in range(H):                          # head split paid once per b
            k_scr[h] = kv[:, h * hd:(h + 1) * hd]
            v_scr[h] = kv[:, D + h * hd:D + (h + 1) * hd]

    # ---- query rows of this tile, sliced from the resident x block -------------
    qs = pl.multiple_of(pl.program_id(1) * TQ, TQ)
    xq = x_ref[pl.ds(qs, TQ), :]                                        # (TQ, D) f32

    # packed (8, D) small vectors: [bq, bo, g1, beta1, bff2, g2, beta2, pad]
    vec = vec_ref[...]
    bq, bo = vec[0:1, :], vec[1:2, :]
    g1, beta1 = vec[2:3, :], vec[3:4, :]
    bff2, g2, beta2 = vec[4:5, :], vec[5:6, :], vec[6:7, :]

    # ---- Q projection (1/sqrt(head_dim) already folded into wq/bq) -------------
    q = jnp.dot(xq.astype(cdt), wq_ref[...],
                preferred_element_type=jnp.float32) + bq                # (TQ, D) f32

    kmask = None
    if seq_len < S_pad:                       # static: no-op when not padded
        kmask = lax.broadcasted_iota(jnp.int32, (1, S_pad), 1) < seq_len

    # ---- multi-head attention: lane-dense 2-D matmuls per head.  Scores keep the
    #      (padded) sequence in the lane dim; per-head outputs are assembled into
    #      attn_scr so the output projection stays ONE full-depth MXU matmul. -----
    for h in range(H):
        qh = q[:, h * hd:(h + 1) * hd].astype(cdt)                      # (TQ, hd)
        s = jnp.einsum('qd,kd->qk', qh, k_scr[h],
                       preferred_element_type=jnp.float32)              # (TQ, S_pad)
        if kmask is not None:
            s = jnp.where(kmask, s, -1e30)
        s = s - jnp.max(s, axis=-1, keepdims=True)
        p = jnp.exp(s)
        denom = jnp.sum(p, axis=-1, keepdims=True)
        if approx_recip:
            p = p * pl.reciprocal(denom, approx=True)   # EUP slot, ~1e-3 rel err
        else:
            p = p / denom
        attn_scr[:, h * hd:(h + 1) * hd] = jnp.dot(
            p.astype(cdt), v_scr[h], preferred_element_type=jnp.float32)

    attn = attn_scr[...]                                                # (TQ, D) f32

    # ---- output projection + residual + LayerNorm1 ------------------------------
    attn_out = jnp.dot(attn.astype(cdt), wo_ref[...],
                       preferred_element_type=jnp.float32) + bo
    y = _layernorm(xq + attn_out, g1, beta1)

    # ---- feed-forward: Linear(D, 4D) -> ReLU -> Linear(4D, D) -------------------
    ff_hidden = jnp.dot(y.astype(cdt), w1_ref[...],
                        preferred_element_type=jnp.float32) + bff1_ref[...]
    ff_hidden = jnp.maximum(ff_hidden, 0.0)
    ff = jnp.dot(ff_hidden.astype(cdt), w2_ref[...],
                 preferred_element_type=jnp.float32) + bff2

    # ---- residual + LayerNorm2 ---------------------------------------------------
    o_ref[...] = _layernorm(y + ff, g2, beta2).astype(o_ref.dtype)


def vit_block(x, params, num_heads, *, q_tile=None, vmem_limit_bytes=None,
              approx_recip=True):
    """x: (B, S, D) float32.  params: dict from prep_kernel_params()."""
    B, S, D = x.shape
    assert D % num_heads == 0

    pref_tile, pref_vmem = _device_defaults()
    if vmem_limit_bytes is None:
        vmem_limit_bytes = pref_vmem

    # Pad S so scores / K-V blocks are lane-dense (multiple of 128 once S is big
    # enough to matter; multiple of 8 otherwise) and q tiles are sublane-aligned.
    if q_tile is not None:
        q_tile = max(1, min(q_tile, _round_up(S, 8)))
        S_pad = _round_up(S, q_tile)
    else:
        S_pad = _round_up(S, 128) if S >= 128 else _round_up(S, 8)
        q_tile = min(pref_tile, S_pad)
        if S_pad % q_tile != 0:
            q_tile = 128 if S_pad % 128 == 0 else S_pad
    assert S_pad % q_tile == 0
    assert q_tile % 8 == 0 or q_tile == S_pad, "q_tile must be 8-aligned"
    n_q = S_pad // q_tile

    if S_pad != S:
        x = jnp.pad(x, ((0, 0), (0, S_pad - S), (0, 0)))

    weight_names = ("wq", "wkv", "wo", "w1", "w2", "bkv", "bff1", "vecs")
    weights = [params[n] for n in weight_names]
    # Grid-invariant weights: constant index_map + single buffering (they are never
    # re-fetched, so double buffering only wastes VMEM — critical on v7x).
    weight_specs = [
        pl.BlockSpec(w.shape, lambda b, qi: (0, 0),
                     pipeline_mode=pl.Buffered(buffer_count=1))
        for w in weights
    ]

    hd = D // num_heads
    kernel = functools.partial(vit_block_kernel, num_heads=num_heads,
                               seq_len=S, approx_recip=approx_recip)

    # Advisory cost model so XLA schedules surrounding HLO sensibly.
    wbytes = sum(int(w.size) * w.dtype.itemsize for w in weights)
    matmul_flops = 2 * B * S_pad * 12 * D * D          # q,kv,o proj + 2x FFN
    attn_flops = 4 * B * S_pad * S_pad * D             # QK^T + PV
    cost = pl.CostEstimate(
        flops=int(matmul_flops + attn_flops),
        transcendentals=int(B * num_heads * S_pad * S_pad),
        bytes_accessed=int(2 * B * S_pad * D * 4 + wbytes),
    )

    out = pl.pallas_call(
        kernel,
        out_shape=jax.ShapeDtypeStruct((B, S_pad, D), x.dtype),
        grid_spec=pltpu.PrefetchScalarGridSpec(
            num_scalar_prefetch=0,
            grid=(B, n_q),
            in_specs=[
                # Full (padded) sequence; block index depends only on b, so it is
                # resident across all qi steps (queries are sliced in-kernel).
                pl.BlockSpec((None, S_pad, D), lambda b, qi: (b, 0, 0)),
            ] + weight_specs,
            out_specs=pl.BlockSpec((None, q_tile, D), lambda b, qi: (b, qi, 0)),
            scratch_shapes=[
                pltpu.VMEM((num_heads, S_pad, hd), jnp.bfloat16),   # K cache
                pltpu.VMEM((num_heads, S_pad, hd), jnp.bfloat16),   # V cache
                pltpu.VMEM((q_tile, D), jnp.float32),               # attn assembly
            ],
        ),
        compiler_params=pltpu.CompilerParams(
            # b parallel (megacore); qi MUST be arbitrary: the per-batch KV scratch
            # is reused across qi and may not be sharded across cores.
            dimension_semantics=("parallel", "arbitrary"),
            vmem_limit_bytes=vmem_limit_bytes,
        ),
        cost_estimate=cost,
    )(x, *weights)

    return out[:, :S, :] if S_pad != S else out


def make_raw_params(key, dim):
    """Deterministic synthetic parameters; shapes match nn.MultiheadAttention /
    nn.LayerNorm / nn.Linear inside ViTBlock.  Stored pre-transposed to (in, out);
    biases / LN params as (1, features)."""
    ks = jax.random.split(key, 12)
    s = 0.1
    in_proj_w = jax.random.normal(ks[0], (3 * dim, dim), jnp.float32) * s
    in_proj_b = jax.random.normal(ks[1], (3 * dim,), jnp.float32) * s
    wq, wk, wv = in_proj_w[:dim], in_proj_w[dim:2 * dim], in_proj_w[2 * dim:]
    bq, bk, bv = in_proj_b[:dim], in_proj_b[dim:2 * dim], in_proj_b[2 * dim:]
    wo = jax.random.normal(ks[2], (dim, dim), jnp.float32) * s
    bo = jax.random.normal(ks[3], (dim,), jnp.float32) * s
    g1 = 1.0 + jax.random.normal(ks[4], (dim,), jnp.float32) * s
    beta1 = jax.random.normal(ks[5], (dim,), jnp.float32) * s
    w1 = jax.random.normal(ks[6], (4 * dim, dim), jnp.float32) * s
    bff1 = jax.random.normal(ks[7], (4 * dim,), jnp.float32) * s
    w2 = jax.random.normal(ks[8], (dim, 4 * dim), jnp.float32) * s
    bff2 = jax.random.normal(ks[9], (dim,), jnp.float32) * s
    g2 = 1.0 + jax.random.normal(ks[10], (dim,), jnp.float32) * s
    beta2 = jax.random.normal(ks[11], (dim,), jnp.float32) * s

    # PyTorch Linear computes x @ W.T + b; pre-transpose to (in, out).
    return {
        "wq": wq.T, "wk": wk.T, "wv": wv.T,
        "bq": bq[None, :], "bk": bk[None, :], "bv": bv[None, :],
        "wo": wo.T, "bo": bo[None, :],
        "g1": g1[None, :], "beta1": beta1[None, :],
        "w1": w1.T, "bff1": bff1[None, :],
        "w2": w2.T, "bff2": bff2[None, :],
        "g2": g2[None, :], "beta2": beta2[None, :],
    }


def prep_kernel_params(p, num_heads, weight_dtype=jnp.bfloat16):
    """One-time host-side prep:
       * fold 1/sqrt(head_dim) into the Q projection,
       * fuse K and V projections into one (D, 2D) matmul,
       * pack the seven (1, D) bias / LayerNorm vectors into one (8, D) array,
       * store matmul weights in bf16 (f32 accumulation in-kernel)."""
    dim = p["wq"].shape[0]
    scale = 1.0 / math.sqrt(dim // num_heads)
    vecs = jnp.concatenate([
        p["bq"] * scale, p["bo"], p["g1"], p["beta1"],
        p["bff2"], p["g2"], p["beta2"], jnp.zeros_like(p["bo"]),
    ], axis=0)                                            # (8, D) f32
    return {
        "wq": (p["wq"] * scale).astype(weight_dtype),
        "wkv": jnp.concatenate([p["wk"], p["wv"]], axis=1).astype(weight_dtype),
        "wo": p["wo"].astype(weight_dtype),
        "w1": p["w1"].astype(weight_dtype),
        "w2": p["w2"].astype(weight_dtype),
        "bkv": jnp.concatenate([p["bk"], p["bv"]], axis=1),   # (1, 2D) f32
        "bff1": p["bff1"],                                    # (1, 4D) f32
        "vecs": vecs,
    }


def vit_block_reference(x, p, num_heads):
    """Pure-JAX f32 reference mirroring nn.MultiheadAttention + ViTBlock forward."""
    B, S, D = x.shape
    hd = D // num_heads
    q = x @ p["wq"] + p["bq"]
    k = x @ p["wk"] + p["bk"]
    v = x @ p["wv"] + p["bv"]

    def split(t):  # (B, S, D) -> (B, H, S, hd)
        return t.reshape(B, S, num_heads, hd).transpose(0, 2, 1, 3)

    qh, kh, vh = split(q), split(k), split(v)
    s = jnp.einsum("bhqd,bhkd->bhqk", qh, kh) / math.sqrt(hd)
    pattn = jax.nn.softmax(s, axis=-1)
    ah = jnp.einsum("bhqk,bhkd->bhqd", pattn, vh)
    attn = ah.transpose(0, 2, 1, 3).reshape(B, S, D)
    attn_out = attn @ p["wo"] + p["bo"]

    def ln(v_, g, b, eps=1e-5):
        mu = jnp.mean(v_, axis=-1, keepdims=True)
        var = jnp.mean((v_ - mu) ** 2, axis=-1, keepdims=True)
        return (v_ - mu) / jnp.sqrt(var + eps) * g + b

    y = ln(x + attn_out, p["g1"], p["beta1"])
    ff = jnp.maximum(y @ p["w1"] + p["bff1"], 0.0) @ p["w2"] + p["bff2"]
    return ln(y + ff, p["g2"], p["beta2"])


if __name__ == "__main__":
    key = jax.random.PRNGKey(0)
    kx1, kx2, kp = jax.random.split(key, 3)

    D, H = 32, 8
    raw_params = make_raw_params(kp, D)
    kernel_params = prep_kernel_params(raw_params, H)

    # Case 1: single query tile, no sequence padding (B=2, S=8, D=32).
    x1 = jax.random.normal(kx1, (2, 8, D), jnp.float32)
    out1 = jax.block_until_ready(vit_block(x1, kernel_params, H))
    ref1 = vit_block_reference(x1, raw_params, H)
    assert out1.shape == x1.shape
    assert jnp.allclose(out1, ref1, rtol=5e-2, atol=5e-2), "case 1 mismatch"

    # Case 2: multi-tile grid + sequence padding + key masking
    # (B=2, S=12 padded to 16, q_tile=8 -> 2 query tiles reusing the KV scratch).
    x2 = jax.random.normal(kx2, (2, 12, D), jnp.float32)
    out2 = jax.block_until_ready(vit_block(x2, kernel_params, H, q_tile=8))
    ref2 = vit_block_reference(x2, raw_params, H)
    assert out2.shape == x2.shape
    assert jnp.allclose(out2, ref2, rtol=5e-2, atol=5e-2), "case 2 mismatch"

    print("KERNEL_OK")
</pallas_src>

<mosaic_0001>
module attributes {stable_mosaic.version = 11 : i64} {
  func.func @vit_block_kernel(%arg0: i32, %arg1: i32, %arg2: memref<1x8x32xf32, #tpu.memory_space<vmem>>, %arg3: memref<32x32xbf16, #tpu.memory_space<vmem>>, %arg4: memref<32x64xbf16, #tpu.memory_space<vmem>>, %arg5: memref<32x32xbf16, #tpu.memory_space<vmem>>, %arg6: memref<32x128xbf16, #tpu.memory_space<vmem>>, %arg7: memref<128x32xbf16, #tpu.memory_space<vmem>>, %arg8: memref<1x64xf32, #tpu.memory_space<vmem>>, %arg9: memref<1x128xf32, #tpu.memory_space<vmem>>, %arg10: memref<8x32xf32, #tpu.memory_space<vmem>>, %arg11: memref<1x8x32xf32, #tpu.memory_space<vmem>>, %arg12: memref<8x8x4xbf16, #tpu.memory_space<vmem>>, %arg13: memref<8x8x4xbf16, #tpu.memory_space<vmem>>, %arg14: memref<8x32xf32, #tpu.memory_space<vmem>>) attributes {dimension_semantics = [#tpu.dimension_semantics<parallel>, #tpu.dimension_semantics<arbitrary>], iteration_bounds = array<i64: 2, 1>, scalar_prefetch = 0 : i64, scratch_operands = 3 : i64, tpu.core_type = #tpu.core_type<tc>, window_params = [{transform_indices = @transform_0, window_bounds = array<i64: 1, 8, 32>}, {pipeline_mode = #tpu.pipeline_mode<synchronous>, transform_indices = @transform_1, window_bounds = array<i64: 32, 32>}, {pipeline_mode = #tpu.pipeline_mode<synchronous>, transform_indices = @transform_2, window_bounds = array<i64: 32, 64>}, {pipeline_mode = #tpu.pipeline_mode<synchronous>, transform_indices = @transform_3, window_bounds = array<i64: 32, 32>}, {pipeline_mode = #tpu.pipeline_mode<synchronous>, transform_indices = @transform_4, window_bounds = array<i64: 32, 128>}, {pipeline_mode = #tpu.pipeline_mode<synchronous>, transform_indices = @transform_5, window_bounds = array<i64: 128, 32>}, {pipeline_mode = #tpu.pipeline_mode<synchronous>, transform_indices = @transform_6, window_bounds = array<i64: 1, 64>}, {pipeline_mode = #tpu.pipeline_mode<synchronous>, transform_indices = @transform_7, window_bounds = array<i64: 1, 128>}, {pipeline_mode = #tpu.pipeline_mode<synchronous>, transform_indices = @transform_8, window_bounds = array<i64: 8, 32>}, {transform_indices = @transform_9, window_bounds = array<i64: 1, 8, 32>}]} {
    %c0_i32 = arith.constant 0 : i32
    %0 = arith.cmpi eq, %arg1, %c0_i32 : i32
    %1 = arith.extui %0 : i1 to i32
    %c0_i32_0 = arith.constant 0 : i32
    %2 = arith.cmpi ne, %1, %c0_i32_0 : i32
    scf.if %2 {
      %c0_116 = arith.constant 0 : index
      %c0_117 = arith.constant 0 : index
      %c0_118 = arith.constant 0 : index
      %245 = vector.load %arg2[%c0_116, %c0_117, %c0_118] : memref<1x8x32xf32, #tpu.memory_space<vmem>>, vector<1x8x32xf32>
      %246 = vector.shape_cast %245 : vector<1x8x32xf32> to vector<8x32xf32>
      %247 = arith.truncf %246 : vector<8x32xf32> to vector<8x32xbf16>
      %c0_119 = arith.constant 0 : index
      %c0_120 = arith.constant 0 : index
      %248 = vector.load %arg4[%c0_119, %c0_120] : memref<32x64xbf16, #tpu.memory_space<vmem>>, vector<32x64xbf16>
      %cst_121 = arith.constant dense<0.000000e+00> : vector<8x64xf32>
      %249 = tpu.matmul %247, %248, %cst_121 {dimension_numbers = #tpu.dot_dimension_numbers<[1], [0], [0], [1], [0, 0, 1, 1], [], []>} : vector<8x32xbf16>, vector<32x64xbf16>, vector<8x64xf32> -> vector<8x64xf32>
      %c0_122 = arith.constant 0 : index
      %c0_123 = arith.constant 0 : index
      %250 = vector.load %arg8[%c0_122, %c0_123] : memref<1x64xf32, #tpu.memory_space<vmem>>, vector<1x64xf32>
      %251 = vector.broadcast %250 : vector<1x64xf32> to vector<8x64xf32>
      %252 = arith.addf %249, %251 : vector<8x64xf32>
      %253 = arith.truncf %252 : vector<8x64xf32> to vector<8x64xbf16>
      %254 = vector.extract_strided_slice %253 {offsets = [0, 0], sizes = [8, 4], strides = [1, 1]} : vector<8x64xbf16> to vector<8x4xbf16>
      %c0_124 = arith.constant 0 : index
      %c0_125 = arith.constant 0 : index
      %c0_126 = arith.constant 0 : index
      %255 = vector.load %arg12[%c0_124, %c0_125, %c0_126] : memref<8x8x4xbf16, #tpu.memory_space<vmem>>, vector<1x8x4xbf16>
      %256 = vector.shape_cast %255 : vector<1x8x4xbf16> to vector<8x4xbf16>
      %257 = vector.shape_cast %254 : vector<8x4xbf16> to vector<1x8x4xbf16>
      tpu.vector_store %arg12[%c0_124, %c0_125, %c0_126], %257 {strides = array<i32>} : memref<8x8x4xbf16, #tpu.memory_space<vmem>>, vector<1x8x4xbf16>,
      %258 = vector.extract_strided_slice %253 {offsets = [0, 32], sizes = [8, 4], strides = [1, 1]} : vector<8x64xbf16> to vector<8x4xbf16>
      %c0_127 = arith.constant 0 : index
      %c0_128 = arith.constant 0 : index
      %c0_129 = arith.constant 0 : index
      %259 = vector.load %arg13[%c0_127, %c0_128, %c0_129] : memref<8x8x4xbf16, #tpu.memory_space<vmem>>, vector<1x8x4xbf16>
      %260 = vector.shape_cast %259 : vector<1x8x4xbf16> to vector<8x4xbf16>
      %261 = vector.shape_cast %258 : vector<8x4xbf16> to vector<1x8x4xbf16>
      tpu.vector_store %arg13[%c0_127, %c0_128, %c0_129], %261 {strides = array<i32>} : memref<8x8x4xbf16, #tpu.memory_space<vmem>>, vector<1x8x4xbf16>,
      %262 = vector.extract_strided_slice %253 {offsets = [0, 4], sizes = [8, 4], strides = [1, 1]} : vector<8x64xbf16> to vector<8x4xbf16>
      %c1_130 = arith.constant 1 : index
      %c0_131 = arith.constant 0 : index
      %c0_132 = arith.constant 0 : index
      %263 = vector.load %arg12[%c1_130, %c0_131, %c0_132] : memref<8x8x4xbf16, #tpu.memory_space<vmem>>, vector<1x8x4xbf16>
      %264 = vector.shape_cast %263 : vector<1x8x4xbf16> to vector<8x4xbf16>
      %265 = vector.shape_cast %262 : vector<8x4xbf16> to vector<1x8x4xbf16>
      tpu.vector_store %arg12[%c1_130, %c0_131, %c0_132], %265 {strides = array<i32>} : memref<8x8x4xbf16, #tpu.memory_space<vmem>>, vector<1x8x4xbf16>,
      %266 = vector.extract_strided_slice %253 {offsets = [0, 36], sizes = [8, 4], strides = [1, 1]} : vector<8x64xbf16> to vector<8x4xbf16>
      %c1_133 = arith.constant 1 : index
      %c0_134 = arith.constant 0 : index
      %c0_135 = arith.constant 0 : index
      %267 = vector.load %arg13[%c1_133, %c0_134, %c0_135] : memref<8x8x4xbf16, #tpu.memory_space<vmem>>, vector<1x8x4xbf16>
      %268 = vector.shape_cast %267 : vector<1x8x4xbf16> to vector<8x4xbf16>
      %269 = vector.shape_cast %266 : vector<8x4xbf16> to vector<1x8x4xbf16>
      tpu.vector_store %arg13[%c1_133, %c0_134, %c0_135], %269 {strides = array<i32>} : memref<8x8x4xbf16, #tpu.memory_space<vmem>>, vector<1x8x4xbf16>,
      %270 = vector.extract_strided_slice %253 {offsets = [0, 8], sizes = [8, 4], strides = [1, 1]} : vector<8x64xbf16> to vector<8x4xbf16>
      %c2_136 = arith.constant 2 : index
      %c0_137 = arith.constant 0 : index
      %c0_138 = arith.constant 0 : index
      %271 = vector.load %arg12[%c2_136, %c0_137, %c0_138] : memref<8x8x4xbf16, #tpu.memory_space<vmem>>, vector<1x8x4xbf16>
      %272 = vector.shape_cast %271 : vector<1x8x4xbf16> to vector<8x4xbf16>
      %273 = vector.shape_cast %270 : vector<8x4xbf16> to vector<1x8x4xbf16>
      tpu.vector_store %arg12[%c2_136, %c0_137, %c0_138], %273 {strides = array<i32>} : memref<8x8x4xbf16, #tpu.memory_space<vmem>>, vector<1x8x4xbf16>,
      %274 = vector.extract_strided_slice %253 {offsets = [0, 40], sizes = [8, 4], strides = [1, 1]} : vector<8x64xbf16> to vector<8x4xbf16>
      %c2_139 = arith.constant 2 : index
      %c0_140 = arith.constant 0 : index
      %c0_141 = arith.constant 0 : index
      %275 = vector.load %arg13[%c2_139, %c0_140, %c0_141] : memref<8x8x4xbf16, #tpu.memory_space<vmem>>, vector<1x8x4xbf16>
      %276 = vector.shape_cast %275 : vector<1x8x4xbf16> to vector<8x4xbf16>
      %277 = vector.shape_cast %274 : vector<8x4xbf16> to vector<1x8x4xbf16>
      tpu.vector_store %arg13[%c2_139, %c0_140, %c0_141], %277 {strides = array<i32>} : memref<8x8x4xbf16, #tpu.memory_space<vmem>>, vector<1x8x4xbf16>,
      %278 = vector.extract_strided_slice %253 {offsets = [0, 12], sizes = [8, 4], strides = [1, 1]} : vector<8x64xbf16> to vector<8x4xbf16>
      %c3_142 = arith.constant 3 : index
      %c0_143 = arith.constant 0 : index
      %c0_144 = arith.constant 0 : index
      %279 = vector.load %arg12[%c3_142, %c0_143, %c0_144] : memref<8x8x4xbf16, #tpu.memory_space<vmem>>, vector<1x8x4xbf16>
      %280 = vector.shape_cast %279 : vector<1x8x4xbf16> to vector<8x4xbf16>
      %281 = vector.shape_cast %278 : vector<8x4xbf16> to vector<1x8x4xbf16>
      tpu.vector_store %arg12[%c3_142, %c0_143, %c0_144], %281 {strides = array<i32>} : memref<8x8x4xbf16, #tpu.memory_space<vmem>>, vector<1x8x4xbf16>,
      %282 = vector.extract_strided_slice %253 {offsets = [0, 44], sizes = [8, 4], strides = [1, 1]} : vector<8x64xbf16> to vector<8x4xbf16>
      %c3_145 = arith.constant 3 : index
      %c0_146 = arith.constant 0 : index
      %c0_147 = arith.constant 0 : index
      %283 = vector.load %arg13[%c3_145, %c0_146, %c0_147] : memref<8x8x4xbf16, #tpu.memory_space<vmem>>, vector<1x8x4xbf16>
      %284 = vector.shape_cast %283 : vector<1x8x4xbf16> to vector<8x4xbf16>
      %285 = vector.shape_cast %282 : vector<8x4xbf16> to vector<1x8x4xbf16>
      tpu.vector_store %arg13[%c3_145, %c0_146, %c0_147], %285 {strides = array<i32>} : memref<8x8x4xbf16, #tpu.memory_space<vmem>>, vector<1x8x4xbf16>,
      %286 = vector.extract_strided_slice %253 {offsets = [0, 16], sizes = [8, 4], strides = [1, 1]} : vector<8x64xbf16> to vector<8x4xbf16>
      %c4_148 = arith.constant 4 : index
      %c0_149 = arith.constant 0 : index
      %c0_150 = arith.constant 0 : index
      %287 = vector.load %arg12[%c4_148, %c0_149, %c0_150] : memref<8x8x4xbf16, #tpu.memory_space<vmem>>, vector<1x8x4xbf16>
      %288 = vector.shape_cast %287 : vector<1x8x4xbf16> to vector<8x4xbf16>
      %289 = vector.shape_cast %286 : vector<8x4xbf16> to vector<1x8x4xbf16>
      tpu.vector_store %arg12[%c4_148, %c0_149, %c0_150], %289 {strides = array<i32>} : memref<8x8x4xbf16, #tpu.memory_space<vmem>>, vector<1x8x4xbf16>,
      %290 = vector.extract_strided_slice %253 {offsets = [0, 48], sizes = [8, 4], strides = [1, 1]} : vector<8x64xbf16> to vector<8x4xbf16>
      %c4_151 = arith.constant 4 : index
      %c0_152 = arith.constant 0 : index
      %c0_153 = arith.constant 0 : index
      %291 = vector.load %arg13[%c4_151, %c0_152, %c0_153] : memref<8x8x4xbf16, #tpu.memory_space<vmem>>, vector<1x8x4xbf16>
      %292 = vector.shape_cast %291 : vector<1x8x4xbf16> to vector<8x4xbf16>
      %293 = vector.shape_cast %290 : vector<8x4xbf16> to vector<1x8x4xbf16>
      tpu.vector_store %arg13[%c4_151, %c0_152, %c0_153], %293 {strides = array<i32>} : memref<8x8x4xbf16, #tpu.memory_space<vmem>>, vector<1x8x4xbf16>,
      %294 = vector.extract_strided_slice %253 {offsets = [0, 20], sizes = [8, 4], strides = [1, 1]} : vector<8x64xbf16> to vector<8x4xbf16>
      %c5_154 = arith.constant 5 : index
      %c0_155 = arith.constant 0 : index
      %c0_156 = arith.constant 0 : index
      %295 = vector.load %arg12[%c5_154, %c0_155, %c0_156] : memref<8x8x4xbf16, #tpu.memory_space<vmem>>, vector<1x8x4xbf16>
      %296 = vector.shape_cast %295 : vector<1x8x4xbf16> to vector<8x4xbf16>
      %297 = vector.shape_cast %294 : vector<8x4xbf16> to vector<1x8x4xbf16>
      tpu.vector_store %arg12[%c5_154, %c0_155, %c0_156], %297 {strides = array<i32>} : memref<8x8x4xbf16, #tpu.memory_space<vmem>>, vector<1x8x4xbf16>,
      %298 = vector.extract_strided_slice %253 {offsets = [0, 52], sizes = [8, 4], strides = [1, 1]} : vector<8x64xbf16> to vector<8x4xbf16>
      %c5_157 = arith.constant 5 : index
      %c0_158 = arith.constant 0 : index
      %c0_159 = arith.constant 0 : index
      %299 = vector.load %arg13[%c5_157, %c0_158, %c0_159] : memref<8x8x4xbf16, #tpu.memory_space<vmem>>, vector<1x8x4xbf16>
      %300 = vector.shape_cast %299 : vector<1x8x4xbf16> to vector<8x4xbf16>
      %301 = vector.shape_cast %298 : vector<8x4xbf16> to vector<1x8x4xbf16>
      tpu.vector_store %arg13[%c5_157, %c0_158, %c0_159], %301 {strides = array<i32>} : memref<8x8x4xbf16, #tpu.memory_space<vmem>>, vector<1x8x4xbf16>,
      %302 = vector.extract_strided_slice %253 {offsets = [0, 24], sizes = [8, 4], strides = [1, 1]} : vector<8x64xbf16> to vector<8x4xbf16>
      %c6_160 = arith.constant 6 : index
      %c0_161 = arith.constant 0 : index
      %c0_162 = arith.constant 0 : index
      %303 = vector.load %arg12[%c6_160, %c0_161, %c0_162] : memref<8x8x4xbf16, #tpu.memory_space<vmem>>, vector<1x8x4xbf16>
      %304 = vector.shape_cast %303 : vector<1x8x4xbf16> to vector<8x4xbf16>
      %305 = vector.shape_cast %302 : vector<8x4xbf16> to vector<1x8x4xbf16>
      tpu.vector_store %arg12[%c6_160, %c0_161, %c0_162], %305 {strides = array<i32>} : memref<8x8x4xbf16, #tpu.memory_space<vmem>>, vector<1x8x4xbf16>,
      %306 = vector.extract_strided_slice %253 {offsets = [0, 56], sizes = [8, 4], strides = [1, 1]} : vector<8x64xbf16> to vector<8x4xbf16>
      %c6_163 = arith.constant 6 : index
      %c0_164 = arith.constant 0 : index
      %c0_165 = arith.constant 0 : index
      %307 = vector.load %arg13[%c6_163, %c0_164, %c0_165] : memref<8x8x4xbf16, #tpu.memory_space<vmem>>, vector<1x8x4xbf16>
      %308 = vector.shape_cast %307 : vector<1x8x4xbf16> to vector<8x4xbf16>
      %309 = vector.shape_cast %306 : vector<8x4xbf16> to vector<1x8x4xbf16>
      tpu.vector_store %arg13[%c6_163, %c0_164, %c0_165], %309 {strides = array<i32>} : memref<8x8x4xbf16, #tpu.memory_space<vmem>>, vector<1x8x4xbf16>,
      %310 = vector.extract_strided_slice %253 {offsets = [0, 28], sizes = [8, 4], strides = [1, 1]} : vector<8x64xbf16> to vector<8x4xbf16>
      %c7_166 = arith.constant 7 : index
      %c0_167 = arith.constant 0 : index
      %c0_168 = arith.constant 0 : index
      %311 = vector.load %arg12[%c7_166, %c0_167, %c0_168] : memref<8x8x4xbf16, #tpu.memory_space<vmem>>, vector<1x8x4xbf16>
      %312 = vector.shape_cast %311 : vector<1x8x4xbf16> to vector<8x4xbf16>
      %313 = vector.shape_cast %310 : vector<8x4xbf16> to vector<1x8x4xbf16>
      tpu.vector_store %arg12[%c7_166, %c0_167, %c0_168], %313 {strides = array<i32>} : memref<8x8x4xbf16, #tpu.memory_space<vmem>>, vector<1x8x4xbf16>,
      %314 = vector.extract_strided_slice %253 {offsets = [0, 60], sizes = [8, 4], strides = [1, 1]} : vector<8x64xbf16> to vector<8x4xbf16>
      %c7_169 = arith.constant 7 : index
      %c0_170 = arith.constant 0 : index
      %c0_171 = arith.constant 0 : index
      %315 = vector.load %arg13[%c7_169, %c0_170, %c0_171] : memref<8x8x4xbf16, #tpu.memory_space<vmem>>, vector<1x8x4xbf16>
      %316 = vector.shape_cast %315 : vector<1x8x4xbf16> to vector<8x4xbf16>
      %317 = vector.shape_cast %314 : vector<8x4xbf16> to vector<1x8x4xbf16>
      tpu.vector_store %arg13[%c7_169, %c0_170, %c0_171], %317 {strides = array<i32>} : memref<8x8x4xbf16, #tpu.memory_space<vmem>>, vector<1x8x4xbf16>,
    } else {
    }
    %c8_i32 = arith.constant 8 : i32
    %3 = arith.muli %arg1, %c8_i32 : i32
    %4 = tpu.assume_multiple %3, 8 : i32
    %c0 = arith.constant 0 : index
    %5 = arith.index_cast %4 : i32 to index
    %c0_1 = arith.constant 0 : index
    %6 = vector.load %arg2[%c0, %5, %c0_1] : memref<1x8x32xf32, #tpu.memory_space<vmem>>, vector<1x8x32xf32>
    %7 = vector.shape_cast %6 : vector<1x8x32xf32> to vector<8x32xf32>
    %c0_2 = arith.constant 0 : index
    %c0_3 = arith.constant 0 : index
    %8 = vector.load %arg10[%c0_2, %c0_3] : memref<8x32xf32, #tpu.memory_space<vmem>>, vector<8x32xf32>
    %9 = vector.extract_strided_slice %8 {offsets = [0, 0], sizes = [1, 32], strides = [1, 1]} : vector<8x32xf32> to vector<1x32xf32>
    %10 = vector.extract_strided_slice %8 {offsets = [1, 0], sizes = [1, 32], strides = [1, 1]} : vector<8x32xf32> to vector<1x32xf32>
    %11 = vector.extract_strided_slice %8 {offsets = [2, 0], sizes = [1, 32], strides = [1, 1]} : vector<8x32xf32> to vector<1x32xf32>
    %12 = vector.extract_strided_slice %8 {offsets = [3, 0], sizes = [1, 32], strides = [1, 1]} : vector<8x32xf32> to vector<1x32xf32>
    %13 = vector.extract_strided_slice %8 {offsets = [4, 0], sizes = [1, 32], strides = [1, 1]} : vector<8x32xf32> to vector<1x32xf32>
    %14 = vector.extract_strided_slice %8 {offsets = [5, 0], sizes = [1, 32], strides = [1, 1]} : vector<8x32xf32> to vector<1x32xf32>
    %15 = vector.extract_strided_slice %8 {offsets = [6, 0], sizes = [1, 32], strides = [1, 1]} : vector<8x32xf32> to vector<1x32xf32>
    %16 = arith.truncf %7 : vector<8x32xf32> to vector<8x32xbf16>
    %c0_4 = arith.constant 0 : index
    %c0_5 = arith.constant 0 : index
    %17 = vector.load %arg3[%c0_4, %c0_5] : memref<32x32xbf16, #tpu.memory_space<vmem>>, vector<32x32xbf16>
    %cst = arith.constant dense<0.000000e+00> : vector<8x32xf32>
    %18 = tpu.matmul %16, %17, %cst {dimension_numbers = #tpu.dot_dimension_numbers<[1], [0], [0], [1], [0, 0, 1, 1], [], []>} : vector<8x32xbf16>, vector<32x32xbf16>, vector<8x32xf32> -> vector<8x32xf32>
    %19 = vector.broadcast %9 : vector<1x32xf32> to vector<8x32xf32>
    %20 = arith.addf %18, %19 : vector<8x32xf32>
    %21 = vector.extract_strided_slice %20 {offsets = [0, 0], sizes = [8, 4], strides = [1, 1]} : vector<8x32xf32> to vector<8x4xf32>
    %22 = arith.truncf %21 : vector<8x4xf32> to vector<8x4xbf16>
    %c0_6 = arith.constant 0 : index
    %c0_7 = arith.constant 0 : index
    %c0_8 = arith.constant 0 : index
    %23 = vector.load %arg12[%c0_6, %c0_7, %c0_8] : memref<8x8x4xbf16, #tpu.memory_space<vmem>>, vector<1x8x4xbf16>
    %24 = vector.shape_cast %23 : vector<1x8x4xbf16> to vector<8x4xbf16>
    "tpu.trace_start"() <{level = 10 : i32, message = "qd,kd->qk"}> : () -> ()
    %cst_9 = arith.constant dense<0.000000e+00> : vector<8x8xf32>
    %25 = tpu.matmul %22, %24, %cst_9 {dimension_numbers = #tpu.dot_dimension_numbers<[1], [1], [0], [0], [0, 0, 1, 0], [], []>} : vector<8x4xbf16>, vector<8x4xbf16>, vector<8x8xf32> -> vector<8x8xf32>
    "tpu.trace_stop"() : () -> ()
    %cst_10 = arith.constant dense<0xFF800000> : vector<8xf32>
    %26 = vector.multi_reduction <maximumf>, %25, %cst_10 [1] : vector<8x8xf32> to vector<8xf32>
    %27 = vector.shape_cast %26 : vector<8xf32> to vector<8x1xf32>
    %28 = vector.broadcast %27 : vector<8x1xf32> to vector<8x8xf32>
    %29 = arith.subf %25, %28 : vector<8x8xf32>
    %30 = math.exp %29 : vector<8x8xf32>
    %cst_11 = arith.constant dense<0.000000e+00> : vector<8xf32>
    %31 = vector.multi_reduction <add>, %30, %cst_11 [1] : vector<8x8xf32> to vector<8xf32>
    %32 = vector.shape_cast %31 : vector<8xf32> to vector<8x1xf32>
    %33 = tpu.reciprocal %32 {approx = true} : vector<8x1xf32> -> vector<8x1xf32>
    %34 = vector.broadcast %33 : vector<8x1xf32> to vector<8x8xf32>
    %35 = arith.mulf %30, %34 : vector<8x8xf32>
    %36 = arith.truncf %35 : vector<8x8xf32> to vector<8x8xbf16>
    %c0_12 = arith.constant 0 : index
    %c0_13 = arith.constant 0 : index
    %c0_14 = arith.constant 0 : index
    %37 = vector.load %arg13[%c0_12, %c0_13, %c0_14] : memref<8x8x4xbf16, #tpu.memory_space<vmem>>, vector<1x8x4xbf16>
    %38 = vector.shape_cast %37 : vector<1x8x4xbf16> to vector<8x4xbf16>
    %cst_15 = arith.constant dense<0.000000e+00> : vector<8x4xf32>
    %39 = tpu.matmul %36, %38, %cst_15 {dimension_numbers = #tpu.dot_dimension_numbers<[1], [0], [0], [1], [0, 0, 1, 1], [], []>} : vector<8x8xbf16>, vector<8x4xbf16>, vector<8x4xf32> -> vector<8x4xf32>
    %c0_16 = arith.constant 0 : index
    %c0_17 = arith.constant 0 : index
    %40 = vector.load %arg14[%c0_16, %c0_17] : memref<8x32xf32, #tpu.memory_space<vmem>>, vector<8x4xf32>
    tpu.vector_store %arg14[%c0_16, %c0_17], %39 {strides = array<i32>} : memref<8x32xf32, #tpu.memory_space<vmem>>, vector<8x4xf32>,
    %41 = vector.extract_strided_slice %20 {offsets = [0, 4], sizes = [8, 4], strides = [1, 1]} : vector<8x32xf32> to vector<8x4xf32>
    %42 = arith.truncf %41 : vector<8x4xf32> to vector<8x4xbf16>
    %c1 = arith.constant 1 : index
    %c0_18 = arith.constant 0 : index
    %c0_19 = arith.constant 0 : index
    %43 = vector.load %arg12[%c1, %c0_18, %c0_19] : memref<8x8x4xbf16, #tpu.memory_space<vmem>>, vector<1x8x4xbf16>
    %44 = vector.shape_cast %43 : vector<1x8x4xbf16> to vector<8x4xbf16>
    "tpu.trace_start"() <{level = 10 : i32, message = "qd,kd->qk"}> : () -> ()
    %cst_20 = arith.constant dense<0.000000e+00> : vector<8x8xf32>
    %45 = tpu.matmul %42, %44, %cst_20 {dimension_numbers = #tpu.dot_dimension_numbers<[1], [1], [0], [0], [0, 0, 1, 0], [], []>} : vector<8x4xbf16>, vector<8x4xbf16>, vector<8x8xf32> -> vector<8x8xf32>
    "tpu.trace_stop"() : () -> ()
    %cst_21 = arith.constant dense<0xFF800000> : vector<8xf32>
    %46 = vector.multi_reduction <maximumf>, %45, %cst_21 [1] : vector<8x8xf32> to vector<8xf32>
    %47 = vector.shape_cast %46 : vector<8xf32> to vector<8x1xf32>
    %48 = vector.broadcast %47 : vector<8x1xf32> to vector<8x8xf32>
    %49 = arith.subf %45, %48 : vector<8x8xf32>
    %50 = math.exp %49 : vector<8x8xf32>
    %cst_22 = arith.constant dense<0.000000e+00> : vector<8xf32>
    %51 = vector.multi_reduction <add>, %50, %cst_22 [1] : vector<8x8xf32> to vector<8xf32>
    %52 = vector.shape_cast %51 : vector<8xf32> to vector<8x1xf32>
    %53 = tpu.reciprocal %52 {approx = true} : vector<8x1xf32> -> vector<8x1xf32>
    %54 = vector.broadcast %53 : vector<8x1xf32> to vector<8x8xf32>
    %55 = arith.mulf %50, %54 : vector<8x8xf32>
    %56 = arith.truncf %55 : vector<8x8xf32> to vector<8x8xbf16>
    %c1_23 = arith.constant 1 : index
    %c0_24 = arith.constant 0 : index
    %c0_25 = arith.constant 0 : index
    %57 = vector.load %arg13[%c1_23, %c0_24, %c0_25] : memref<8x8x4xbf16, #tpu.memory_space<vmem>>, vector<1x8x4xbf16>
    %58 = vector.shape_cast %57 : vector<1x8x4xbf16> to vector<8x4xbf16>
    %cst_26 = arith.constant dense<0.000000e+00> : vector<8x4xf32>
    %59 = tpu.matmul %56, %58, %cst_26 {dimension_numbers = #tpu.dot_dimension_numbers<[1], [0], [0], [1], [0, 0, 1, 1], [], []>} : vector<8x8xbf16>, vector<8x4xbf16>, vector<8x4xf32> -> vector<8x4xf32>
    %c0_27 = arith.constant 0 : index
    %c4 = arith.constant 4 : index
    %60 = vector.load %arg14[%c0_27, %c4] : memref<8x32xf32, #tpu.memory_space<vmem>>, vector<8x4xf32>
    tpu.vector_store %arg14[%c0_27, %c4], %59 {strides = array<i32>} : memref<8x32xf32, #tpu.memory_space<vmem>>, vector<8x4xf32>,
    %61 = vector.extract_strided_slice %20 {offsets = [0, 8], sizes = [8, 4], strides = [1, 1]} : vector<8x32xf32> to vector<8x4xf32>
    %62 = arith.truncf %61 : vector<8x4xf32> to vector<8x4xbf16>
    %c2 = arith.constant 2 : index
    %c0_28 = arith.constant 0 : index
    %c0_29 = arith.constant 0 : index
    %63 = vector.load %arg12[%c2, %c0_28, %c0_29] : memref<8x8x4xbf16, #tpu.memory_space<vmem>>, vector<1x8x4xbf16>
    %64 = vector.shape_cast %63 : vector<1x8x4xbf16> to vector<8x4xbf16>
    "tpu.trace_start"() <{level = 10 : i32, message = "qd,kd->qk"}> : () -> ()
    %cst_30 = arith.constant dense<0.000000e+00> : vector<8x8xf32>
    %65 = tpu.matmul %62, %64, %cst_30 {dimension_numbers = #tpu.dot_dimension_numbers<[1], [1], [0], [0], [0, 0, 1, 0], [], []>} : vector<8x4xbf16>, vector<8x4xbf16>, vector<8x8xf32> -> vector<8x8xf32>
    "tpu.trace_stop"() : () -> ()
    %cst_31 = arith.constant dense<0xFF800000> : vector<8xf32>
    %66 = vector.multi_reduction <maximumf>, %65, %cst_31 [1] : vector<8x8xf32> to vector<8xf32>
    %67 = vector.shape_cast %66 : vector<8xf32> to vector<8x1xf32>
    %68 = vector.broadcast %67 : vector<8x1xf32> to vector<8x8xf32>
    %69 = arith.subf %65, %68 : vector<8x8xf32>
    %70 = math.exp %69 : vector<8x8xf32>
    %cst_32 = arith.constant dense<0.000000e+00> : vector<8xf32>
    %71 = vector.multi_reduction <add>, %70, %cst_32 [1] : vector<8x8xf32> to vector<8xf32>
    %72 = vector.shape_cast %71 : vector<8xf32> to vector<8x1xf32>
    %73 = tpu.reciprocal %72 {approx = true} : vector<8x1xf32> -> vector<8x1xf32>
    %74 = vector.broadcast %73 : vector<8x1xf32> to vector<8x8xf32>
    %75 = arith.mulf %70, %74 : vector<8x8xf32>
    %76 = arith.truncf %75 : vector<8x8xf32> to vector<8x8xbf16>
    %c2_33 = arith.constant 2 : index
    %c0_34 = arith.constant 0 : index
    %c0_35 = arith.constant 0 : index
    %77 = vector.load %arg13[%c2_33, %c0_34, %c0_35] : memref<8x8x4xbf16, #tpu.memory_space<vmem>>, vector<1x8x4xbf16>
    %78 = vector.shape_cast %77 : vector<1x8x4xbf16> to vector<8x4xbf16>
    %cst_36 = arith.constant dense<0.000000e+00> : vector<8x4xf32>
    %79 = tpu.matmul %76, %78, %cst_36 {dimension_numbers = #tpu.dot_dimension_numbers<[1], [0], [0], [1], [0, 0, 1, 1], [], []>} : vector<8x8xbf16>, vector<8x4xbf16>, vector<8x4xf32> -> vector<8x4xf32>
    %c0_37 = arith.constant 0 : index
    %c8 = arith.constant 8 : index
    %80 = vector.load %arg14[%c0_37, %c8] : memref<8x32xf32, #tpu.memory_space<vmem>>, vector<8x4xf32>
    tpu.vector_store %arg14[%c0_37, %c8], %79 {strides = array<i32>} : memref<8x32xf32, #tpu.memory_space<vmem>>, vector<8x4xf32>,
    %81 = vector.extract_strided_slice %20 {offsets = [0, 12], sizes = [8, 4], strides = [1, 1]} : vector<8x32xf32> to vector<8x4xf32>
    %82 = arith.truncf %81 : vector<8x4xf32> to vector<8x4xbf16>
    %c3 = arith.constant 3 : index
    %c0_38 = arith.constant 0 : index
    %c0_39 = arith.constant 0 : index
    %83 = vector.load %arg12[%c3, %c0_38, %c0_39] : memref<8x8x4xbf16, #tpu.memory_space<vmem>>, vector<1x8x4xbf16>
    %84 = vector.shape_cast %83 : vector<1x8x4xbf16> to vector<8x4xbf16>
    "tpu.trace_start"() <{level = 10 : i32, message = "qd,kd->qk"}> : () -> ()
    %cst_40 = arith.constant dense<0.000000e+00> : vector<8x8xf32>
    %85 = tpu.matmul %82, %84, %cst_40 {dimension_numbers = #tpu.dot_dimension_numbers<[1], [1], [0], [0], [0, 0, 1, 0], [], []>} : vector<8x4xbf16>, vector<8x4xbf16>, vector<8x8xf32> -> vector<8x8xf32>
    "tpu.trace_stop"() : () -> ()
    %cst_41 = arith.constant dense<0xFF800000> : vector<8xf32>
    %86 = vector.multi_reduction <maximumf>, %85, %cst_41 [1] : vector<8x8xf32> to vector<8xf32>
    %87 = vector.shape_cast %86 : vector<8xf32> to vector<8x1xf32>
    %88 = vector.broadcast %87 : vector<8x1xf32> to vector<8x8xf32>
    %89 = arith.subf %85, %88 : vector<8x8xf32>
    %90 = math.exp %89 : vector<8x8xf32>
    %cst_42 = arith.constant dense<0.000000e+00> : vector<8xf32>
    %91 = vector.multi_reduction <add>, %90, %cst_42 [1] : vector<8x8xf32> to vector<8xf32>
    %92 = vector.shape_cast %91 : vector<8xf32> to vector<8x1xf32>
    %93 = tpu.reciprocal %92 {approx = true} : vector<8x1xf32> -> vector<8x1xf32>
    %94 = vector.broadcast %93 : vector<8x1xf32> to vector<8x8xf32>
    %95 = arith.mulf %90, %94 : vector<8x8xf32>
    %96 = arith.truncf %95 : vector<8x8xf32> to vector<8x8xbf16>
    %c3_43 = arith.constant 3 : index
    %c0_44 = arith.constant 0 : index
    %c0_45 = arith.constant 0 : index
    %97 = vector.load %arg13[%c3_43, %c0_44, %c0_45] : memref<8x8x4xbf16, #tpu.memory_space<vmem>>, vector<1x8x4xbf16>
    %98 = vector.shape_cast %97 : vector<1x8x4xbf16> to vector<8x4xbf16>
    %cst_46 = arith.constant dense<0.000000e+00> : vector<8x4xf32>
    %99 = tpu.matmul %96, %98, %cst_46 {dimension_numbers = #tpu.dot_dimension_numbers<[1], [0], [0], [1], [0, 0, 1, 1], [], []>} : vector<8x8xbf16>, vector<8x4xbf16>, vector<8x4xf32> -> vector<8x4xf32>
    %c0_47 = arith.constant 0 : index
    %c12 = arith.constant 12 : index
    %100 = vector.load %arg14[%c0_47, %c12] : memref<8x32xf32, #tpu.memory_space<vmem>>, vector<8x4xf32>
    tpu.vector_store %arg14[%c0_47, %c12], %99 {strides = array<i32>} : memref<8x32xf32, #tpu.memory_space<vmem>>, vector<8x4xf32>,
    %101 = vector.extract_strided_slice %20 {offsets = [0, 16], sizes = [8, 4], strides = [1, 1]} : vector<8x32xf32> to vector<8x4xf32>
    %102 = arith.truncf %101 : vector<8x4xf32> to vector<8x4xbf16>
    %c4_48 = arith.constant 4 : index
    %c0_49 = arith.constant 0 : index
    %c0_50 = arith.constant 0 : index
    %103 = vector.load %arg12[%c4_48, %c0_49, %c0_50] : memref<8x8x4xbf16, #tpu.memory_space<vmem>>, vector<1x8x4xbf16>
    %104 = vector.shape_cast %103 : vector<1x8x4xbf16> to vector<8x4xbf16>
    "tpu.trace_start"() <{level = 10 : i32, message = "qd,kd->qk"}> : () -> ()
    %cst_51 = arith.constant dense<0.000000e+00> : vector<8x8xf32>
    %105 = tpu.matmul %102, %104, %cst_51 {dimension_numbers = #tpu.dot_dimension_numbers<[1], [1], [0], [0], [0, 0, 1, 0], [], []>} : vector<8x4xbf16>, vector<8x4xbf16>, vector<8x8xf32> -> vector<8x8xf32>
    "tpu.trace_stop"() : () -> ()
    %cst_52 = arith.constant dense<0xFF800000> : vector<8xf32>
    %106 = vector.multi_reduction <maximumf>, %105, %cst_52 [1] : vector<8x8xf32> to vector<8xf32>
    %107 = vector.shape_cast %106 : vector<8xf32> to vector<8x1xf32>
    %108 = vector.broadcast %107 : vector<8x1xf32> to vector<8x8xf32>
    %109 = arith.subf %105, %108 : vector<8x8xf32>
    %110 = math.exp %109 : vector<8x8xf32>
    %cst_53 = arith.constant dense<0.000000e+00> : vector<8xf32>
    %111 = vector.multi_reduction <add>, %110, %cst_53 [1] : vector<8x8xf32> to vector<8xf32>
    %112 = vector.shape_cast %111 : vector<8xf32> to vector<8x1xf32>
    %113 = tpu.reciprocal %112 {approx = true} : vector<8x1xf32> -> vector<8x1xf32>
    %114 = vector.broadcast %113 : vector<8x1xf32> to vector<8x8xf32>
    %115 = arith.mulf %110, %114 : vector<8x8xf32>
    %116 = arith.truncf %115 : vector<8x8xf32> to vector<8x8xbf16>
    %c4_54 = arith.constant 4 : index
    %c0_55 = arith.constant 0 : index
    %c0_56 = arith.constant 0 : index
    %117 = vector.load %arg13[%c4_54, %c0_55, %c0_56] : memref<8x8x4xbf16, #tpu.memory_space<vmem>>, vector<1x8x4xbf16>
    %118 = vector.shape_cast %117 : vector<1x8x4xbf16> to vector<8x4xbf16>
    %cst_57 = arith.constant dense<0.000000e+00> : vector<8x4xf32>
    %119 = tpu.matmul %116, %118, %cst_57 {dimension_numbers = #tpu.dot_dimension_numbers<[1], [0], [0], [1], [0, 0, 1, 1], [], []>} : vector<8x8xbf16>, vector<8x4xbf16>, vector<8x4xf32> -> vector<8x4xf32>
    %c0_58 = arith.constant 0 : index
    %c16 = arith.constant 16 : index
    %120 = vector.load %arg14[%c0_58, %c16] : memref<8x32xf32, #tpu.memory_space<vmem>>, vector<8x4xf32>
    tpu.vector_store %arg14[%c0_58, %c16], %119 {strides = array<i32>} : memref<8x32xf32, #tpu.memory_space<vmem>>, vector<8x4xf32>,
    %121 = vector.extract_strided_slice %20 {offsets = [0, 20], sizes = [8, 4], strides = [1, 1]} : vector<8x32xf32> to vector<8x4xf32>
    %122 = arith.truncf %121 : vector<8x4xf32> to vector<8x4xbf16>
    %c5 = arith.constant 5 : index
    %c0_59 = arith.constant 0 : index
    %c0_60 = arith.constant 0 : index
    %123 = vector.load %arg12[%c5, %c0_59, %c0_60] : memref<8x8x4xbf16, #tpu.memory_space<vmem>>, vector<1x8x4xbf16>
    %124 = vector.shape_cast %123 : vector<1x8x4xbf16> to vector<8x4xbf16>
    "tpu.trace_start"() <{level = 10 : i32, message = "qd,kd->qk"}> : () -> ()
    %cst_61 = arith.constant dense<0.000000e+00> : vector<8x8xf32>
    %125 = tpu.matmul %122, %124, %cst_61 {dimension_numbers = #tpu.dot_dimension_numbers<[1], [1], [0], [0], [0, 0, 1, 0], [], []>} : vector<8x4xbf16>, vector<8x4xbf16>, vector<8x8xf32> -> vector<8x8xf32>
    "tpu.trace_stop"() : () -> ()
    %cst_62 = arith.constant dense<0xFF800000> : vector<8xf32>
    %126 = vector.multi_reduction <maximumf>, %125, %cst_62 [1] : vector<8x8xf32> to vector<8xf32>
    %127 = vector.shape_cast %126 : vector<8xf32> to vector<8x1xf32>
    %128 = vector.broadcast %127 : vector<8x1xf32> to vector<8x8xf32>
    %129 = arith.subf %125, %128 : vector<8x8xf32>
    %130 = math.exp %129 : vector<8x8xf32>
    %cst_63 = arith.constant dense<0.000000e+00> : vector<8xf32>
    %131 = vector.multi_reduction <add>, %130, %cst_63 [1] : vector<8x8xf32> to vector<8xf32>
    %132 = vector.shape_cast %131 : vector<8xf32> to vector<8x1xf32>
    %133 = tpu.reciprocal %132 {approx = true} : vector<8x1xf32> -> vector<8x1xf32>
    %134 = vector.broadcast %133 : vector<8x1xf32> to vector<8x8xf32>
    %135 = arith.mulf %130, %134 : vector<8x8xf32>
    %136 = arith.truncf %135 : vector<8x8xf32> to vector<8x8xbf16>
    %c5_64 = arith.constant 5 : index
    %c0_65 = arith.constant 0 : index
    %c0_66 = arith.constant 0 : index
    %137 = vector.load %arg13[%c5_64, %c0_65, %c0_66] : memref<8x8x4xbf16, #tpu.memory_space<vmem>>, vector<1x8x4xbf16>
    %138 = vector.shape_cast %137 : vector<1x8x4xbf16> to vector<8x4xbf16>
    %cst_67 = arith.constant dense<0.000000e+00> : vector<8x4xf32>
    %139 = tpu.matmul %136, %138, %cst_67 {dimension_numbers = #tpu.dot_dimension_numbers<[1], [0], [0], [1], [0, 0, 1, 1], [], []>} : vector<8x8xbf16>, vector<8x4xbf16>, vector<8x4xf32> -> vector<8x4xf32>
    %c0_68 = arith.constant 0 : index
    %c20 = arith.constant 20 : index
    %140 = vector.load %arg14[%c0_68, %c20] : memref<8x32xf32, #tpu.memory_space<vmem>>, vector<8x4xf32>
    tpu.vector_store %arg14[%c0_68, %c20], %139 {strides = array<i32>} : memref<8x32xf32, #tpu.memory_space<vmem>>, vector<8x4xf32>,
    %141 = vector.extract_strided_slice %20 {offsets = [0, 24], sizes = [8, 4], strides = [1, 1]} : vector<8x32xf32> to vector<8x4xf32>
    %142 = arith.truncf %141 : vector<8x4xf32> to vector<8x4xbf16>
    %c6 = arith.constant 6 : index
    %c0_69 = arith.constant 0 : index
    %c0_70 = arith.constant 0 : index
    %143 = vector.load %arg12[%c6, %c0_69, %c0_70] : memref<8x8x4xbf16, #tpu.memory_space<vmem>>, vector<1x8x4xbf16>
    %144 = vector.shape_cast %143 : vector<1x8x4xbf16> to vector<8x4xbf16>
    "tpu.trace_start"() <{level = 10 : i32, message = "qd,kd->qk"}> : () -> ()
    %cst_71 = arith.constant dense<0.000000e+00> : vector<8x8xf32>
    %145 = tpu.matmul %142, %144, %cst_71 {dimension_numbers = #tpu.dot_dimension_numbers<[1], [1], [0], [0], [0, 0, 1, 0], [], []>} : vector<8x4xbf16>, vector<8x4xbf16>, vector<8x8xf32> -> vector<8x8xf32>
    "tpu.trace_stop"() : () -> ()
    %cst_72 = arith.constant dense<0xFF800000> : vector<8xf32>
    %146 = vector.multi_reduction <maximumf>, %145, %cst_72 [1] : vector<8x8xf32> to vector<8xf32>
    %147 = vector.shape_cast %146 : vector<8xf32> to vector<8x1xf32>
    %148 = vector.broadcast %147 : vector<8x1xf32> to vector<8x8xf32>
    %149 = arith.subf %145, %148 : vector<8x8xf32>
    %150 = math.exp %149 : vector<8x8xf32>
    %cst_73 = arith.constant dense<0.000000e+00> : vector<8xf32>
    %151 = vector.multi_reduction <add>, %150, %cst_73 [1] : vector<8x8xf32> to vector<8xf32>
    %152 = vector.shape_cast %151 : vector<8xf32> to vector<8x1xf32>
    %153 = tpu.reciprocal %152 {approx = true} : vector<8x1xf32> -> vector<8x1xf32>
    %154 = vector.broadcast %153 : vector<8x1xf32> to vector<8x8xf32>
    %155 = arith.mulf %150, %154 : vector<8x8xf32>
    %156 = arith.truncf %155 : vector<8x8xf32> to vector<8x8xbf16>
    %c6_74 = arith.constant 6 : index
    %c0_75 = arith.constant 0 : index
    %c0_76 = arith.constant 0 : index
    %157 = vector.load %arg13[%c6_74, %c0_75, %c0_76] : memref<8x8x4xbf16, #tpu.memory_space<vmem>>, vector<1x8x4xbf16>
    %158 = vector.shape_cast %157 : vector<1x8x4xbf16> to vector<8x4xbf16>
    %cst_77 = arith.constant dense<0.000000e+00> : vector<8x4xf32>
    %159 = tpu.matmul %156, %158, %cst_77 {dimension_numbers = #tpu.dot_dimension_numbers<[1], [0], [0], [1], [0, 0, 1, 1], [], []>} : vector<8x8xbf16>, vector<8x4xbf16>, vector<8x4xf32> -> vector<8x4xf32>
    %c0_78 = arith.constant 0 : index
    %c24 = arith.constant 24 : index
    %160 = vector.load %arg14[%c0_78, %c24] : memref<8x32xf32, #tpu.memory_space<vmem>>, vector<8x4xf32>
    tpu.vector_store %arg14[%c0_78, %c24], %159 {strides = array<i32>} : memref<8x32xf32, #tpu.memory_space<vmem>>, vector<8x4xf32>,
    %161 = vector.extract_strided_slice %20 {offsets = [0, 28], sizes = [8, 4], strides = [1, 1]} : vector<8x32xf32> to vector<8x4xf32>
    %162 = arith.truncf %161 : vector<8x4xf32> to vector<8x4xbf16>
    %c7 = arith.constant 7 : index
    %c0_79 = arith.constant 0 : index
    %c0_80 = arith.constant 0 : index
    %163 = vector.load %arg12[%c7, %c0_79, %c0_80] : memref<8x8x4xbf16, #tpu.memory_space<vmem>>, vector<1x8x4xbf16>
    %164 = vector.shape_cast %163 : vector<1x8x4xbf16> to vector<8x4xbf16>
    "tpu.trace_start"() <{level = 10 : i32, message = "qd,kd->qk"}> : () -> ()
    %cst_81 = arith.constant dense<0.000000e+00> : vector<8x8xf32>
    %165 = tpu.matmul %162, %164, %cst_81 {dimension_numbers = #tpu.dot_dimension_numbers<[1], [1], [0], [0], [0, 0, 1, 0], [], []>} : vector<8x4xbf16>, vector<8x4xbf16>, vector<8x8xf32> -> vector<8x8xf32>
    "tpu.trace_stop"() : () -> ()
    %cst_82 = arith.constant dense<0xFF800000> : vector<8xf32>
    %166 = vector.multi_reduction <maximumf>, %165, %cst_82 [1] : vector<8x8xf32> to vector<8xf32>
    %167 = vector.shape_cast %166 : vector<8xf32> to vector<8x1xf32>
    %168 = vector.broadcast %167 : vector<8x1xf32> to vector<8x8xf32>
    %169 = arith.subf %165, %168 : vector<8x8xf32>
    %170 = math.exp %169 : vector<8x8xf32>
    %cst_83 = arith.constant dense<0.000000e+00> : vector<8xf32>
    %171 = vector.multi_reduction <add>, %170, %cst_83 [1] : vector<8x8xf32> to vector<8xf32>
    %172 = vector.shape_cast %171 : vector<8xf32> to vector<8x1xf32>
    %173 = tpu.reciprocal %172 {approx = true} : vector<8x1xf32> -> vector<8x1xf32>
    %174 = vector.broadcast %173 : vector<8x1xf32> to vector<8x8xf32>
    %175 = arith.mulf %170, %174 : vector<8x8xf32>
    %176 = arith.truncf %175 : vector<8x8xf32> to vector<8x8xbf16>
    %c7_84 = arith.constant 7 : index
    %c0_85 = arith.constant 0 : index
    %c0_86 = arith.constant 0 : index
    %177 = vector.load %arg13[%c7_84, %c0_85, %c0_86] : memref<8x8x4xbf16, #tpu.memory_space<vmem>>, vector<1x8x4xbf16>
    %178 = vector.shape_cast %177 : vector<1x8x4xbf16> to vector<8x4xbf16>
    %cst_87 = arith.constant dense<0.000000e+00> : vector<8x4xf32>
    %179 = tpu.matmul %176, %178, %cst_87 {dimension_numbers = #tpu.dot_dimension_numbers<[1], [0], [0], [1], [0, 0, 1, 1], [], []>} : vector<8x8xbf16>, vector<8x4xbf16>, vector<8x4xf32> -> vector<8x4xf32>
    %c0_88 = arith.constant 0 : index
    %c28 = arith.constant 28 : index
    %180 = vector.load %arg14[%c0_88, %c28] : memref<8x32xf32, #tpu.memory_space<vmem>>, vector<8x4xf32>
    tpu.vector_store %arg14[%c0_88, %c28], %179 {strides = array<i32>} : memref<8x32xf32, #tpu.memory_space<vmem>>, vector<8x4xf32>,
    %c0_89 = arith.constant 0 : index
    %c0_90 = arith.constant 0 : index
    %181 = vector.load %arg14[%c0_89, %c0_90] : memref<8x32xf32, #tpu.memory_space<vmem>>, vector<8x32xf32>
    %182 = arith.truncf %181 : vector<8x32xf32> to vector<8x32xbf16>
    %c0_91 = arith.constant 0 : index
    %c0_92 = arith.constant 0 : index
    %183 = vector.load %arg5[%c0_91, %c0_92] : memref<32x32xbf16, #tpu.memory_space<vmem>>, vector<32x32xbf16>
    %cst_93 = arith.constant dense<0.000000e+00> : vector<8x32xf32>
    %184 = tpu.matmul %182, %183, %cst_93 {dimension_numbers = #tpu.dot_dimension_numbers<[1], [0], [0], [1], [0, 0, 1, 1], [], []>} : vector<8x32xbf16>, vector<32x32xbf16>, vector<8x32xf32> -> vector<8x32xf32>
    %185 = vector.broadcast %10 : vector<1x32xf32> to vector<8x32xf32>
    %186 = arith.addf %184, %185 : vector<8x32xf32>
    %187 = arith.addf %7, %186 : vector<8x32xf32>
    %cst_94 = arith.constant dense<0.000000e+00> : vector<8xf32>
    %188 = vector.multi_reduction <add>, %187, %cst_94 [1] : vector<8x32xf32> to vector<8xf32>
    %189 = vector.shape_cast %188 : vector<8xf32> to vector<8x1xf32>
    %cst_95 = arith.constant 3.200000e+01 : f32
    %190 = vector.broadcast %cst_95 : f32 to vector<8x1xf32>
    %191 = arith.divf %189, %190 : vector<8x1xf32>
    %192 = vector.broadcast %191 : vector<8x1xf32> to vector<8x32xf32>
    %193 = arith.subf %187, %192 : vector<8x32xf32>
    %194 = arith.mulf %193, %193 : vector<8x32xf32>
    %cst_96 = arith.constant dense<0.000000e+00> : vector<8xf32>
    %195 = vector.multi_reduction <add>, %194, %cst_96 [1] : vector<8x32xf32> to vector<8xf32>
    %196 = vector.shape_cast %195 : vector<8xf32> to vector<8x1xf32>
    %cst_97 = arith.constant 3.200000e+01 : f32
    %197 = vector.broadcast %cst_97 : f32 to vector<8x1xf32>
    %198 = arith.divf %196, %197 : vector<8x1xf32>
    %cst_98 = arith.constant 9.99999974E-6 : f32
    %199 = vector.broadcast %cst_98 : f32 to vector<8x1xf32>
    %200 = arith.addf %198, %199 : vector<8x1xf32>
    %201 = math.rsqrt %200 : vector<8x1xf32>
    %202 = vector.broadcast %201 : vector<8x1xf32> to vector<8x32xf32>
    %203 = arith.mulf %193, %202 : vector<8x32xf32>
    %204 = vector.broadcast %11 : vector<1x32xf32> to vector<8x32xf32>
    %205 = arith.mulf %203, %204 : vector<8x32xf32>
    %206 = vector.broadcast %12 : vector<1x32xf32> to vector<8x32xf32>
    %207 = arith.addf %205, %206 : vector<8x32xf32>
    %208 = arith.truncf %207 : vector<8x32xf32> to vector<8x32xbf16>
    %c0_99 = arith.constant 0 : index
    %c0_100 = arith.constant 0 : index
    %209 = vector.load %arg6[%c0_99, %c0_100] : memref<32x128xbf16, #tpu.memory_space<vmem>>, vector<32x128xbf16>
    %cst_101 = arith.constant dense<0.000000e+00> : vector<8x128xf32>
    %210 = tpu.matmul %208, %209, %cst_101 {dimension_numbers = #tpu.dot_dimension_numbers<[1], [0], [0], [1], [0, 0, 1, 1], [], []>} : vector<8x32xbf16>, vector<32x128xbf16>, vector<8x128xf32> -> vector<8x128xf32>
    %c0_102 = arith.constant 0 : index
    %c0_103 = arith.constant 0 : index
    %211 = vector.load %arg9[%c0_102, %c0_103] : memref<1x128xf32, #tpu.memory_space<vmem>>, vector<1x128xf32>
    %212 = vector.broadcast %211 : vector<1x128xf32> to vector<8x128xf32>
    %213 = arith.addf %210, %212 : vector<8x128xf32>
    %cst_104 = arith.constant 0.000000e+00 : f32
    %214 = vector.broadcast %cst_104 : f32 to vector<8x128xf32>
    %215 = arith.maximumf %213, %214 : vector<8x128xf32>
    %216 = arith.truncf %215 : vector<8x128xf32> to vector<8x128xbf16>
    %c0_105 = arith.constant 0 : index
    %c0_106 = arith.constant 0 : index
    %217 = vector.load %arg7[%c0_105, %c0_106] : memref<128x32xbf16, #tpu.memory_space<vmem>>, vector<128x32xbf16>
    %cst_107 = arith.constant dense<0.000000e+00> : vector<8x32xf32>
    %218 = tpu.matmul %216, %217, %cst_107 {dimension_numbers = #tpu.dot_dimension_numbers<[1], [0], [0], [1], [0, 0, 1, 1], [], []>} : vector<8x128xbf16>, vector<128x32xbf16>, vector<8x32xf32> -> vector<8x32xf32>
    %219 = vector.broadcast %13 : vector<1x32xf32> to vector<8x32xf32>
    %220 = arith.addf %218, %219 : vector<8x32xf32>
    %221 = arith.addf %207, %220 : vector<8x32xf32>
    %cst_108 = arith.constant dense<0.000000e+00> : vector<8xf32>
    %222 = vector.multi_reduction <add>, %221, %cst_108 [1] : vector<8x32xf32> to vector<8xf32>
    %223 = vector.shape_cast %222 : vector<8xf32> to vector<8x1xf32>
    %cst_109 = arith.constant 3.200000e+01 : f32
    %224 = vector.broadcast %cst_109 : f32 to vector<8x1xf32>
    %225 = arith.divf %223, %224 : vector<8x1xf32>
    %226 = vector.broadcast %225 : vector<8x1xf32> to vector<8x32xf32>
    %227 = arith.subf %221, %226 : vector<8x32xf32>
    %228 = arith.mulf %227, %227 : vector<8x32xf32>
    %cst_110 = arith.constant dense<0.000000e+00> : vector<8xf32>
    %229 = vector.multi_reduction <add>, %228, %cst_110 [1] : vector<8x32xf32> to vector<8xf32>
    %230 = vector.shape_cast %229 : vector<8xf32> to vector<8x1xf32>
    %cst_111 = arith.constant 3.200000e+01 : f32
    %231 = vector.broadcast %cst_111 : f32 to vector<8x1xf32>
    %232 = arith.divf %230, %231 : vector<8x1xf32>
    %cst_112 = arith.constant 9.99999974E-6 : f32
    %233 = vector.broadcast %cst_112 : f32 to vector<8x1xf32>
    %234 = arith.addf %232, %233 : vector<8x1xf32>
    %235 = math.rsqrt %234 : vector<8x1xf32>
    %236 = vector.broadcast %235 : vector<8x1xf32> to vector<8x32xf32>
    %237 = arith.mulf %227, %236 : vector<8x32xf32>
    %238 = vector.broadcast %14 : vector<1x32xf32> to vector<8x32xf32>
    %239 = arith.mulf %237, %238 : vector<8x32xf32>
    %240 = vector.broadcast %15 : vector<1x32xf32> to vector<8x32xf32>
    %241 = arith.addf %239, %240 : vector<8x32xf32>
    %c0_113 = arith.constant 0 : index
    %c0_114 = arith.constant 0 : index
    %c0_115 = arith.constant 0 : index
    %242 = vector.load %arg11[%c0_113, %c0_114, %c0_115] : memref<1x8x32xf32, #tpu.memory_space<vmem>>, vector<1x8x32xf32>
    %243 = vector.shape_cast %242 : vector<1x8x32xf32> to vector<8x32xf32>
    %244 = vector.shape_cast %241 : vector<8x32xf32> to vector<1x8x32xf32>
    tpu.vector_store %arg11[%c0_113, %c0_114, %c0_115], %244 {strides = array<i32>} : memref<1x8x32xf32, #tpu.memory_space<vmem>>, vector<1x8x32xf32>,
    return
  }
  func.func @transform_0(%arg0: i32, %arg1: i32) -> (i32, i32, i32) {
    %c0_i32 = arith.constant 0 : i32
    %c0_i32_0 = arith.constant 0 : i32
    %c0_i32_1 = arith.constant 0 : i32
    return %arg0, %c0_i32, %c0_i32_0 : i32, i32, i32
  }
  func.func @transform_1(%arg0: i32, %arg1: i32) -> (i32, i32) {
    %c0_i32 = arith.constant 0 : i32
    %c0_i32_0 = arith.constant 0 : i32
    %c0_i32_1 = arith.constant 0 : i32
    return %c0_i32, %c0_i32_0 : i32, i32
  }
  func.func @transform_2(%arg0: i32, %arg1: i32) -> (i32, i32) {
    %c0_i32 = arith.constant 0 : i32
    %c0_i32_0 = arith.constant 0 : i32
    %c0_i32_1 = arith.constant 0 : i32
    return %c0_i32, %c0_i32_0 : i32, i32
  }
  func.func @transform_3(%arg0: i32, %arg1: i32) -> (i32, i32) {
    %c0_i32 = arith.constant 0 : i32
    %c0_i32_0 = arith.constant 0 : i32
    %c0_i32_1 = arith.constant 0 : i32
    return %c0_i32, %c0_i32_0 : i32, i32
  }
  func.func @transform_4(%arg0: i32, %arg1: i32) -> (i32, i32) {
    %c0_i32 = arith.constant 0 : i32
    %c0_i32_0 = arith.constant 0 : i32
    %c0_i32_1 = arith.constant 0 : i32
    return %c0_i32, %c0_i32_0 : i32, i32
  }
  func.func @transform_5(%arg0: i32, %arg1: i32) -> (i32, i32) {
    %c0_i32 = arith.constant 0 : i32
    %c0_i32_0 = arith.constant 0 : i32
    %c0_i32_1 = arith.constant 0 : i32
    return %c0_i32, %c0_i32_0 : i32, i32
  }
  func.func @transform_6(%arg0: i32, %arg1: i32) -> (i32, i32) {
    %c0_i32 = arith.constant 0 : i32
    %c0_i32_0 = arith.constant 0 : i32
    %c0_i32_1 = arith.constant 0 : i32
    return %c0_i32, %c0_i32_0 : i32, i32
  }
  func.func @transform_7(%arg0: i32, %arg1: i32) -> (i32, i32) {
    %c0_i32 = arith.constant 0 : i32
    %c0_i32_0 = arith.constant 0 : i32
    %c0_i32_1 = arith.constant 0 : i32
    return %c0_i32, %c0_i32_0 : i32, i32
  }
  func.func @transform_8(%arg0: i32, %arg1: i32) -> (i32, i32) {
    %c0_i32 = arith.constant 0 : i32
    %c0_i32_0 = arith.constant 0 : i32
    %c0_i32_1 = arith.constant 0 : i32
    return %c0_i32, %c0_i32_0 : i32, i32
  }
  func.func @transform_9(%arg0: i32, %arg1: i32) -> (i32, i32, i32) {
    %c0_i32 = arith.constant 0 : i32
    %c0_i32_0 = arith.constant 0 : i32
    return %arg0, %arg1, %c0_i32 : i32, i32, i32
  }
}

</mosaic_0001>

<bundles_post_ra>
// kernel: tpu_custom_call.1
= control target key start
LH: loop header
LB: loop body
LE: loop exit
PB: predicated region body
PF: predicated region fallthrough
CT: control target
= control target key end

     0   :  { %s2787_s0 = inlined_call_operand.vmem [shape: f32[2,8,32], index: 0, kind: input, shape index: {}]   ;;  %s2788_s1 = inlined_call_operand.vmem [shape: bf16[32,32], index: 1, kind: input, shape index: {}]   ;;  %s2789_s2 = inlined_call_operand.vmem [shape: bf16[32,64], index: 2, kind: input, shape index: {}]   ;;  %s2790_s3 = inlined_call_operand.vmem [shape: bf16[32,32], index: 3, kind: input, shape index: {}]   ;;  %s2791_s4 = inlined_call_operand.vmem [shape: bf16[32,128], index: 4, kind: input, shape index: {}]   ;;  %s2792_s5 = inlined_call_operand.vmem [shape: bf16[128,32], index: 5, kind: input, shape index: {}]   ;;  %s2793_s6 = inlined_call_operand.vmem [shape: f32[1,64], index: 6, kind: input, shape index: {}]   ;;  %s2794_s7 = inlined_call_operand.vmem [shape: f32[1,128], index: 7, kind: input, shape index: {}]   ;;  %s2795_s8 = inlined_call_operand.vmem [shape: f32[8,32], index: 8, kind: input, shape index: {}]   ;;  %s2796_s9 = inlined_call_operand.hbm [shape: f32[2,8,32], index: 9, kind: output, shape index: {}]  }
   0x1   :  { %2797 = sst [smem:[#allocation8_spill]] %s2787_s0 }
   0x2   :  { %14 = vsyncpa [#allocation6], 0 }
   0x3   :  { %16 = vsyncpa [#allocation6 + $0x1], 0  ;;  %s2402_s30 = smov 0   ;;  %s2404_s10 = smov 0  }
   0x4   :  { %s2406_s11 = smov 0   ;;  %s2408_s12 = smov 0  }
   0x5   :  { %s2410_s13 = smov 0   ;;  %s2412_s14 = smov 0  }
   0x6 LB: > { %s1866_s15 = sadd.s32 4294967295, %s2325_s14   ;;  %s1867_s16 = sadd.s32 4294967294, %s2325_s14   ;;  %s2325_s14 = sphi %s2412_s14, %s22_s14   ;;  %s2321_s13 = sphi %s2410_s13, %s2805_s13   ;;  %s2317_s12 = sphi %s2408_s12, %s2804_s12   ;;  %s2313_s11 = sphi %s2406_s11, %s2803_s11   ;;  %s2309_s10 = sphi %s2404_s10, %s2802_s10   ;;  %s2305_s30 = sphi %s2402_s30, %s2801_s30  }
   0x7   : > { %s34_s17 = sadd.s32 1, %s2321_s13  ;;  %s237_s18 = sadd.s32 1, %s2313_s11 }
   0x8   : > { %p36_p0 = scmp.ge.s32.totalorder %s34_s17, 2  ;;  %p247_p1 = scmp.ne.s32.totalorder %s2313_s11, %s2309_s10 }
   0x9   : > { %p248_p2 = scmp.eq.s32.totalorder %s1866_s15, 1  ;;  %p253_p3 = scmp.ne.s32.totalorder %s2309_s10, %s2305_s30 }
   0xa   : > { %s2807_s17 = smov (%p36_p0, %s34_s17), 0  ;;  %p254_p5 = scmp.eq.s32.totalorder %s1867_s16, 1 }
   0xb   : > { %p2442_p4 = por %p248_p2, %p247_p1  ;;  %s232_s20 = ssub.s32 %s2321_s13, %s2807_s17 }
   0xc   : > { %p1870_p6 = scmp.ge.s32.totalorder %s2325_s14, 1  ;;  %p235_p7 = scmp.eq.s32.totalorder %s232_s20, 0 }
   0xd   : > { %p2449_p8 = por %p254_p5, %p253_p3  ;;  %p303_p9 = scmp.lt.s32.totalorder %s2325_s14, 3 }
   0xe   : > { %s2455_s22 = scalar_select %p235_p7, %s2313_s11, %s237_s18  }
   0xf   : > { %p304_p10 = pnand %p1870_p6, %p303_p9 }
  0x10   : > { %p338_p11 = scmp.lt.s32.totalorder (!%p304_p10), %s2317_s12, 1  ;;  %s2800_s0 = sld [smem:[#allocation8_spill]] (!%p304_p10) }
  0x11   : > { %307 = sbr.rel (%p304_p10) target bundleno = 2495 (0x9bf), region = 56  ;;  %s2329_s29 = smov (!%p304_p10), 116  }
  0x12   : > { %s2330_s15 = smov (!%p304_p10), 124   ;;  %s2331_s16 = smov (!%p304_p10), 120  }
  0x13   : > { %s2332_s18 = smov (!%p304_p10), 112   ;;  %s2334_s23 = smov (!%p304_p10), 104  }
  0x14   : > { %s2335_s24 = smov (!%p304_p10), 100   ;;  %s2336_s25 = smov (!%p304_p10), 92  }
  0x15   : > { %s2337_s26 = smov (!%p304_p10), 88  }
  0x16   : > { %v2197_v0 = vld [vmem:[%s2789_s2 + $0x8] sm:$0xff]   ;;  %v2327_v1 = vmov 0.0   ;;  %v2198_v2 = vld [vmem:[%s2789_s2] sm:$0xff]   ;;  %vm2328_vm0 = vmmov 0   ;;  %s339_s27 = scalar_select %p338_p11, %s2317_s12, 1  ;;  %vm372_vm1 = vcmask 261120   ;;  %v505_v7 = vlaneseq }
  0x17   : > { %1970 = vmatprep.subr.bf16.mxu1 %v2327_v1  ;;  %1998 = vmatprep.subr.bf16.mxu0 %v2327_v1  ;;  %v2199_v3 = vld [vmem:[%s2788_s1 + $0x8] sm:$0xff]   ;;  %v2200_v6 = vld [vmem:[%s2788_s1] sm:$0xff]   ;;  %vm417_vm2 = vcmask 27648   ;;  %vm567_vm3 = vcmask 31744   ;;  %vm614_vm4 = vcmask 64512   ;;  %vm631_vm5 = vcmask 1043456  }
  0x18   : > { %1971 = vmatpush3.bf16.msra.mxu1 %v2197_v0  ;;  %1974 = vmatprep.mubr.msk.bf16.mxu1 %vm2328_vm0, %v2327_v1  ;;  %s1872_s28 = sshll.u32 %s339_s27, 3  ;;  %v2494_v8 = vshrl.u32 %v505_v7, 7  ;;  %v1873_v9 = vld [vmem:[%s2793_s6] ss:$0 sm:$0xff]  ;;  %s2338_s27 = smov 96   ;;  %vm791_vm6 = vcmask 64544  }
  0x19   : > { %1972 = vmatprep.subr.bf16.mxu1 %v2327_v1  ;;  %2000 = vmatprep.mubr.msk.bf16.mxu0 %vm2328_vm0, %v2327_v1  ;;  %s341_s20 = scalar_lea.vmem %s2800_s0, %s1872_s28  ;;  %v2503_v14 = vld [vmem:[%s2795_s8] sm:$0xff]  ;;  %s2339_s28 = smov 80   ;;  %vm907_vm7 = vcmask 97344   ;;  %vm1023_vm8 = vcmask 130144   ;;  %vm1139_vm9 = vcmask 162944   ;;  %vm1255_vm10 = vcmask 195744  }
  0x1a   : > { %v2479_v4 = vld [vmem:[%s341_s20] sm:$0xff]  ;;  %v507_v12 = vsub.s32 0, %v2494_v8  ;;  %s2333_s20 = smov 108   ;;  %vm1371_vm11 = vcmask 228544   ;;  %vm1487_vm12 = vcmask 261344  }
  0x1b   : > { %v348_v5 = vpack.c.bf16 %v2479_v4, %v2479_v4 }
  0x1c   : > { %1973 = vmatpush3.bf16.msra.mxu1 %v2198_v2  ;;  %v508_v17 = vrot.slane %v2503_v14, %v507_v12 }
  0x1d   : > { %1978 = vmatprep.subr.bf16.mxu1 %v2327_v1 }
  0x1f   : > { %1975 = vmatmul.mubr.msk.bf16.vlgmr.msra.gmra.mxu1 %vm372_vm1, %v348_v5 }
  0x20   : > { %1979 = vmatpush3.bf16.msra.mxu1 %v2199_v3  ;;  %1982 = vmatprep.mubr.msk.bf16.mxu1 %vm2328_vm0, %v2327_v1 }
  0x21   : > { %1980 = vmatprep.subr.bf16.mxu1 %v2327_v1 }
  0x24   : > { %1981 = vmatpush3.bf16.msra.mxu1 %v2200_v6 }
  0x25   : > { %1986 = vmatprep.subr.bf16.mxu1 %v2327_v1 }
  0x27   : > { %1983 = vmatmul.mubr.msk.bf16.vlgmr.msra.gmra.mxu1 %vm372_vm1, %v348_v5 }
  0x28   : > { %1988 = vmatprep.mubr.msk.bf16.mxu1 %vm2328_vm0, %v2327_v1 }
  0xdf   : > { %v410_v10 = vpop.f32.mrf.mxu1 }
  0xe0   : > { %v411_v11 = vadd.f32 %v1873_v9, %v410_v10 }
  0xe1   : > { %v1976_v13 = vpop.f32.mrf.mxu1 }
  0xe2   : > { %v2505_v15 = vpack.c.bf16 %v411_v11, %v411_v11 }
  0xe3   : > { %v413_v16 = vpop.f32.mrf.mxu1 }
  0xe4   : > { %446 = vrot.lane.b32.xlu1 %v2505_v15, %s2329_s29  ;;  %426 = vrot.lane.b32.xlu0 %v2505_v15, %s2330_s15  ;;  %418 = vst.msk [vmem:[#allocation2] sm:$0xf] %vm417_vm2, %v2505_v15 }
  0xe5   : > { %v1977_v18 = vpop.f32.mrf.mxu1 }
  0xe7   : > { %v559_v19 = vpop.f32.mrf.mxu1 }
  0xe8   : > { %v560_v20 = vadd.f32 %v559_v19, %v508_v17  ;;  %436 = vrot.lane.b32.xlu0 %v2505_v15, %s2331_s16 }
  0xe9   : > { %v1984_v21 = vpop.f32.mrf.mxu1 }
  0xea   : > { %v565_v22 = vpack.c.bf16 %v560_v20, %v560_v20 }
  0xeb   : > { %v562_v23 = vpop.f32.mrf.mxu1  ;;  %v566_v24 = vld [vmem:[#allocation2] sm:$0xf] }
  0xec   : > { %456 = vrot.lane.b32.xlu0 %v2505_v15, %s2332_s18  ;;  %679 = vrot.lane.b32.xlu1 %v565_v22, %s2330_s15  ;;  %v572_v25 = vsel %vm567_vm3, %v566_v24, 0  ;;  %s2341_s15 = smov 76  }
  0xed   : > { %1987 = vmatpush3.bf16.xpose.msra.mxu1 %v572_v25  ;;  %v1985_v26 = vpop.f32.mrf.mxu1 }
  0xee   : > { %1992 = vmatprep.subr.bf16.mxu1 %v2327_v1 }
  0xf0   : > { %466 = vrot.lane.b32.xlu0 %v2505_v15, %s2333_s20  ;;  %795 = vrot.lane.b32.xlu1 %v565_v22, %s2331_s16  ;;  %s2342_s16 = smov 72  }
  0xf4   : > { %476 = vrot.lane.b32.xlu0 %v2505_v15, %s2334_s23  ;;  %911 = vrot.lane.b32.xlu1 %v565_v22, %s2329_s29  ;;  %s2340_s29 = smov 84  }
  0xf5   : > { %1989 = vmatmul.mubr.msk.bf16.vlgmr.msra.gmra.mxu1 %vm567_vm3, %v565_v22 }
  0xf6   : > { %1994 = vmatprep.mubr.msk.bf16.mxu1 %vm2328_vm0, %v2327_v1 }
  0xf8   : > { %486 = vrot.lane.b32.xlu0 %v2505_v15, %s2335_s24  ;;  %1027 = vrot.lane.b32.xlu1 %v565_v22, %s2332_s18  ;;  %s2343_s18 = smov 68  }
  0xfc   : > { %1259 = vrot.lane.b32.xlu0 %v565_v22, %s2334_s23  ;;  %1143 = vrot.lane.b32.xlu1 %v565_v22, %s2333_s20  ;;  %s2344_s20 = smov 4   ;;  %s2345_s23 = smov 8  }
 0x100   : > { %1375 = vrot.lane.b32.xlu1 %v565_v22, %s2335_s24  ;;  %s2346_s24 = smov 12  }
 0x156   : > { %v447_v27 = vpop.permute.xlu1 %446  ;;  %v427_v28 = vpop.permute.xlu0 %426 }
 0x157   : > { %450 = vst.msk [vmem:[#allocation2 + $0xc] sm:$0xf] %vm417_vm2, %v447_v27  ;;  %430 = vst.msk [vmem:[#allocation2 + $0x4] sm:$0xf] %vm417_vm2, %v427_v28 }
 0x15a   : > { %v437_v29 = vpop.permute.xlu0 %436 }
 0x15b   : > { %440 = vst.msk [vmem:[#allocation2 + $0x8] sm:$0xf] %vm417_vm2, %v437_v29 }
 0x15e   : > { %v457_v30 = vpop.permute.xlu0 %456  ;;  %v677_v31 = vld [vmem:[#allocation2 + $0x4] sm:$0xf]  ;;  %v680_v35 = vpop.permute.xlu1 %679  ;;  %v910_v39 = vld [vmem:[#allocation2 + $0xc] sm:$0xf] }
 0x15f   : > { %460 = vst.msk [vmem:[#allocation2 + $0x10] sm:$0xf] %vm417_vm2, %v457_v30  ;;  %v685_v32 = vsel %vm567_vm3, %v677_v31, 0  ;;  %v917_v41 = vsel %vm567_vm3, %v910_v39, 0 }
 0x160   : > { %1999 = vmatpush3.bf16.xpose.msra.mxu0 %v685_v32 }
 0x161   : > { %2010 = vmatprep.subr.bf16.mxu0 %v2327_v1 }
 0x162   : > { %v467_v33 = vpop.permute.xlu0 %466  ;;  %v794_v34 = vld [vmem:[#allocation2 + $0x8] sm:$0xf]  ;;  %v796_v40 = vpop.permute.xlu1 %795 }
 0x163   : > { %470 = vst.msk [vmem:[#allocation2 + $0x14] sm:$0xf] %vm417_vm2, %v467_v33  ;;  %v801_v37 = vsel %vm567_vm3, %v794_v34, 0 }
 0x166   : > { %v477_v36 = vpop.permute.xlu0 %476  ;;  %v1026_v42 = vld [vmem:[#allocation2 + $0x10] sm:$0xf]  ;;  %v912_v43 = vpop.permute.xlu1 %911 }
 0x167   : > { %480 = vst.msk [vmem:[#allocation2 + $0x18] sm:$0xf] %vm417_vm2, %v477_v36  ;;  %2001 = vmatmul.mubr.msk.bf16.vlgmr.msra.gmra.mxu0 %vm567_vm3, %v680_v35  ;;  %v1033_v44 = vsel %vm567_vm3, %v1026_v42, 0 }
 0x168   : > { %2011 = vmatpush3.bf16.xpose.msra.mxu0 %v801_v37  ;;  %2012 = vmatprep.mubr.msk.bf16.mxu0 %vm2328_vm0, %v2327_v1 }
 0x169   : > { %2022 = vmatprep.subr.bf16.mxu0 %v2327_v1 }
 0x16a   : > { %v487_v38 = vpop.permute.xlu0 %486  ;;  %v1142_v45 = vld [vmem:[#allocation2 + $0x14] sm:$0xf]  ;;  %v1028_v46 = vpop.permute.xlu1 %1027 }
 0x16b   : > { %490 = vst.msk [vmem:[#allocation2 + $0x1c] sm:$0xf] %vm417_vm2, %v487_v38  ;;  %v1149_v47 = vsel %vm567_vm3, %v1142_v45, 0 }
 0x16e   : > { %v1258_v48 = vld [vmem:[#allocation2 + $0x18] sm:$0xf]  ;;  %v1144_v49 = vpop.permute.xlu1 %1143  ;;  %v1260_v52 = vpop.permute.xlu0 %1259 }
 0x16f   : > { %2013 = vmatmul.mubr.msk.bf16.vlgmr.msra.gmra.mxu0 %vm567_vm3, %v796_v40  ;;  %v1265_v50 = vsel %vm567_vm3, %v1258_v48, 0 }
 0x170   : > { %2023 = vmatpush3.bf16.xpose.msra.mxu0 %v917_v41  ;;  %2024 = vmatprep.mubr.msk.bf16.mxu0 %vm2328_vm0, %v2327_v1 }
 0x171   : > { %2034 = vmatprep.subr.bf16.mxu0 %v2327_v1 }
 0x172   : > { %v1374_v51 = vld [vmem:[#allocation2 + $0x1c] sm:$0xf]  ;;  %v1376_v54 = vpop.permute.xlu1 %1375 }
 0x173   : > { %v1381_v53 = vsel %vm567_vm3, %v1374_v51, 0 }
 0x177   : > { %2025 = vmatmul.mubr.msk.bf16.vlgmr.msra.gmra.mxu0 %vm567_vm3, %v912_v43 }
 0x178   : > { %2035 = vmatpush3.bf16.xpose.msra.mxu0 %v1033_v44  ;;  %2036 = vmatprep.mubr.msk.bf16.mxu0 %vm2328_vm0, %v2327_v1 }
 0x179   : > { %2046 = vmatprep.subr.bf16.mxu0 %v2327_v1 }
 0x17f   : > { %2037 = vmatmul.mubr.msk.bf16.vlgmr.msra.gmra.mxu0 %vm567_vm3, %v1028_v46 }
 0x180   : > { %2047 = vmatpush3.bf16.xpose.msra.mxu0 %v1149_v47  ;;  %2048 = vmatprep.mubr.msk.bf16.mxu0 %vm2328_vm0, %v2327_v1 }
 0x181   : > { %2058 = vmatprep.subr.bf16.mxu0 %v2327_v1 }
 0x187   : > { %2049 = vmatmul.mubr.msk.bf16.vlgmr.msra.gmra.mxu0 %vm567_vm3, %v1144_v49 }
 0x188   : > { %2059 = vmatpush3.bf16.xpose.msra.mxu0 %v1265_v50  ;;  %2060 = vmatprep.mubr.msk.bf16.mxu0 %vm2328_vm0, %v2327_v1 }
 0x189   : > { %2070 = vmatprep.subr.bf16.mxu0 %v2327_v1 }
 0x18f   : > { %2061 = vmatmul.mubr.msk.bf16.vlgmr.msra.gmra.mxu0 %vm567_vm3, %v1260_v52 }
 0x190   : > { %2071 = vmatpush3.bf16.xpose.msra.mxu0 %v1381_v53  ;;  %2072 = vmatprep.mubr.msk.bf16.mxu0 %vm2328_vm0, %v2327_v1 }
 0x191   : > { %2082 = vmatprep.subr.bf16.mxu0 %v2327_v1 }
 0x197   : > { %2073 = vmatmul.mubr.msk.bf16.vlgmr.msra.gmra.mxu0 %vm567_vm3, %v1376_v54 }
 0x198   : > { %2086 = vmatprep.mubr.msk.bf16.mxu0 %vm2328_vm0, %v2327_v1 }
 0x1b5   : > { %v608_v55 = vpop.f32.mrf.mxu1 }
 0x1b6   : > { %v615_v56 = vsel %vm614_vm4, %v608_v55, -inf }
 0x1b7   : > { %616 = vmax.xlane.f32.xlu0 %v615_v56  ;;  %v1990_v57 = vpop.f32.mrf.mxu1 }
 0x1b9   : > { %v611_v58 = vpop.f32.mrf.mxu1 }
 0x1bb   : > { %v1991_v59 = vpop.f32.mrf.mxu1 }
 0x227   : > { %v721_v60 = vpop.f32.mrf.mxu0 }
 0x228   : > { %v727_v61 = vsel %vm614_vm4, %v721_v60, -inf }
 0x229   : > { %728 = vmax.xlane.f32.xlu1 %v727_v61  ;;  %v2002_v62 = vpop.f32.mrf.mxu0 }
 0x22b   : > { %v724_v63 = vpop.f32.mrf.mxu0 }
 0x22d   : > { %v2003_v0 = vpop.f32.mrf.mxu0 }
 0x22f   : > { %v837_v2 = vpop.f32.mrf.mxu0 }
 0x230   : > { %v843_v3 = vsel %vm614_vm4, %v837_v2, -inf }
 0x231   : > { %v2014_v5 = vpop.f32.mrf.mxu0  ;;  %844 = vmax.xlane.f32.xlu0 %v843_v3 }
 0x233   : > { %v840_v6 = vpop.f32.mrf.mxu0 }
 0x235   : > { %v2015_v7 = vpop.f32.mrf.mxu0 }
 0x237   : > { %v953_v9 = vpop.f32.mrf.mxu0 }
 0x238   : > { %v959_v10 = vsel %vm614_vm4, %v953_v9, -inf }
 0x239   : > { %v2026_v11 = vpop.f32.mrf.mxu0  ;;  %960 = vmax.xlane.f32.xlu0 %v959_v10 }
 0x23b   : > { %v956_v12 = vpop.f32.mrf.mxu0 }
 0x23d   : > { %v2027_v13 = vpop.f32.mrf.mxu0 }
 0x23f   : > { %v1069_v16 = vpop.f32.mrf.mxu0 }
 0x240   : > { %v617_v17 = vpop.xlane.xlu0 %616  ;;  %v1075_v18 = vsel %vm614_vm4, %v1069_v16, -inf }
 0x241   : > { %v618_v19 = vsub.f32 %v608_v55, %v617_v17  ;;  %1076 = vmax.xlane.f32.xlu1 %v1075_v18  ;;  %v2038_v20 = vpop.f32.mrf.mxu0 }
 0x243   : > { %v619_v21 = vmul.f32 1.442695, %v618_v19  ;;  %v1072_v22 = vpop.f32.mrf.mxu0 }
 0x245   : > { %2213 = vpow2.f32 %v619_v21  ;;  %v2039_v23 = vpop.f32.mrf.mxu0 }
 0x247   : > { %v2569_v24 = vpop.f32.mrf.mxu0 }
 0x248   : > { %v1191_v25 = vsel %vm614_vm4, %v2569_v24, -inf }
 0x249   : > { %v2050_v26 = vpop.f32.mrf.mxu0  ;;  %1192 = vmax.xlane.f32.xlu0 %v1191_v25 }
 0x24b   : > { %v1188_v27 = vpop.f32.mrf.mxu0 }
 0x24d   : > { %v2051_v28 = vpop.f32.mrf.mxu0 }
 0x24f   : > { %v2573_v29 = vpop.f32.mrf.mxu0 }
 0x250   : > { %v1307_v30 = vsel %vm614_vm4, %v2573_v29, -inf }
 0x251   : > { %1308 = vmax.xlane.f32.xlu1 %v1307_v30  ;;  %v2062_v31 = vpop.f32.mrf.mxu0 }
 0x252   : > { %v2214_v32 = vpop.eup %2213 }
 0x253   : > { %v1304_v33 = vpop.f32.mrf.mxu0  ;;  %v621_v34 = vsel %vm614_vm4, %v2214_v32, 0.0 }
 0x255   : > { %v2063_v35 = vpop.f32.mrf.mxu0  ;;  %622 = vadd.xlane.f32.xlu1 %v621_v34 }
 0x257   : > { %v2578_v36 = vpop.f32.mrf.mxu0 }
 0x258   : > { %v1423_v37 = vsel %vm614_vm4, %v2578_v36, -inf }
 0x259   : > { %v2074_v38 = vpop.f32.mrf.mxu0  ;;  %1424 = vmax.xlane.f32.xlu0 %v1423_v37 }
 0x25b   : > { %v1420_v39 = vpop.f32.mrf.mxu0 }
 0x25d   : > { %v2075_v40 = vpop.f32.mrf.mxu0 }
 0x266   : > { %431 = vrot.lane.b32.xlu1 %v2505_v15, %s2336_s25  ;;  %s2347_s25 = smov 16  }
 0x26a   : > { %441 = vrot.lane.b32.xlu1 %v2505_v15, %s2337_s26  ;;  %s2348_s26 = smov 20  }
 0x26f   : > { %422 = vrot.lane.b32.xlu0 %v2505_v15, %s2338_s27 }
 0x2b2   : > { %v729_v41 = vpop.xlane.xlu1 %728 }
 0x2b3   : > { %v730_v42 = vsub.f32 %v721_v60, %v729_v41 }
 0x2b5   : > { %v731_v43 = vmul.f32 1.442695, %v730_v42 }
 0x2b7   : > { %2215 = vpow2.f32 %v731_v43 }
 0x2ba   : > { %v845_v44 = vpop.xlane.xlu0 %844 }
 0x2bb   : > { %v846_v45 = vsub.f32 %v837_v2, %v845_v44 }
 0x2bd   : > { %v847_v46 = vmul.f32 1.442695, %v846_v45 }
 0x2bf   : > { %2217 = vpow2.f32 %v847_v46 }
 0x2c2   : > { %v961_v47 = vpop.xlane.xlu0 %960 }
 0x2c3   : > { %v962_v48 = vsub.f32 %v953_v9, %v961_v47 }
 0x2c4   : > { %v2585_v49 = vpop.eup %2215 }
 0x2c5   : > { %v963_v50 = vmul.f32 1.442695, %v962_v48  ;;  %v733_v51 = vsel %vm614_vm4, %v2585_v49, 0.0 }
 0x2c6   : > { %734 = vadd.xlane.f32.xlu0 %v733_v51 }
 0x2c7   : > { %2219 = vpow2.f32 %v963_v50 }
 0x2ca   : > { %v1077_v52 = vpop.xlane.xlu1 %1076 }
 0x2cb   : > { %v1078_v53 = vsub.f32 %v1069_v16, %v1077_v52 }
 0x2cc   : > { %v2589_v54 = vpop.eup %2217 }
 0x2cd   : > { %v1079_v55 = vmul.f32 1.442695, %v1078_v53  ;;  %v849_v56 = vsel %vm614_vm4, %v2589_v54, 0.0 }
 0x2ce   : > { %850 = vadd.xlane.f32.xlu1 %v849_v56 }
 0x2cf   : > { %2221 = vpow2.f32 %v1079_v55 }
 0x2d2   : > { %v1193_v62 = vpop.xlane.xlu0 %1192 }
 0x2d3   : > { %v1194_v13 = vsub.f32 %v2569_v24, %v1193_v62 }
 0x2d4   : > { %v2593_v57 = vpop.eup %2219 }
 0x2d5   : > { %v965_v58 = vsel %vm614_vm4, %v2593_v57, 0.0  ;;  %v1195_v17 = vmul.f32 1.442695, %v1194_v13 }
 0x2d6   : > { %966 = vadd.xlane.f32.xlu1 %v965_v58 }
 0x2da   : > { %v1309_v59 = vpop.xlane.xlu1 %1308 }
 0x2db   : > { %v1310_v18 = vsub.f32 %v2573_v29, %v1309_v59 }
 0x2dc   : > { %v2597_v60 = vpop.eup %2221 }
 0x2dd   : > { %v1081_v61 = vsel %vm614_vm4, %v2597_v60, 0.0  ;;  %v1311_v19 = vmul.f32 1.442695, %v1310_v18 }
 0x2de   : > { %1082 = vadd.xlane.f32.xlu0 %v1081_v61  ;;  %v623_v63 = vpop.xlane.xlu1 %622 }
 0x2df   : > { %2223 = vrcp.f32 %v623_v63 }
 0x2e0   : > { %2225 = vpow2.f32 %v1195_v17 }
 0x2e1   : > { %2227 = vpow2.f32 %v1311_v19 }
 0x2e2   : > { %v432_v0 = vpop.permute.xlu1 %431  ;;  %v1425_v2 = vpop.xlane.xlu0 %1424 }
 0x2e3   : > { %435 = vst.msk [vmem:[#allocation3 + $0x4] sm:$0xf] %vm417_vm2, %v432_v0  ;;  %v1426_v20 = vsub.f32 %v2578_v36, %v1425_v2 }
 0x2e5   : > { %v1427_v21 = vmul.f32 1.442695, %v1426_v20 }
 0x2e6   : > { %v442_v3 = vpop.permute.xlu1 %441  ;;  %v423_v5 = vpop.permute.xlu0 %422 }
 0x2e7   : > { %445 = vst.msk [vmem:[#allocation3 + $0x8] sm:$0xf] %vm417_vm2, %v442_v3  ;;  %425 = vst.msk [vmem:[#allocation3] sm:$0xf] %vm417_vm2, %v423_v5  ;;  %461 = vrot.lane.b32.xlu1 %v2505_v15, %s2339_s28  ;;  %2229 = vpow2.f32 %v1427_v21 }
 0x2ea   : > { %v740_v11 = vld [vmem:[#allocation3 + $0x4] sm:$0xf] }
 0x2eb   : > { %v745_v16 = vsel %vm631_vm5, %v740_v11, 0 }
 0x2ec   : > { %v2224_v6 = vpop.eup %2223 }
 0x2ed   : > { %v625_v9 = vmul.f32 %v2224_v6, %v2214_v32  ;;  %v2616_v22 = vpop.eup %2225 }
 0x2ee   : > { %v627_v7 = vld [vmem:[#allocation3] sm:$0xf]  ;;  %v1197_v23 = vsel %vm614_vm4, %v2616_v22, 0.0  ;;  %v2620_v24 = vpop.eup %2227  ;;  %v856_v33 = vld [vmem:[#allocation3 + $0x8] sm:$0xf] }
 0x2ef   : > { %v633_v10 = vsel %vm631_vm5, %v627_v7, 0  ;;  %v626_v12 = vpack.c.bf16 %v625_v9, %v625_v9  ;;  %v1313_v25 = vsel %vm614_vm4, %v2620_v24, 0.0  ;;  %v861_v35 = vsel %vm631_vm5, %v856_v33, 0 }
 0x2f0   : > { %1993 = vmatpush3.bf16.msra.mxu1 %v633_v10 }
 0x2f1   : > { %2004 = vmatprep.subr.bf16.mxu1 %v2327_v1 }
 0x2f3   : > { %1995 = vmatmul.mubr.msk.bf16.vlgmr.msra.gmra.mxu1 %vm614_vm4, %v626_v12 }
 0x2f4   : > { %451 = vrot.lane.b32.xlu0 %v2505_v15, %s2340_s29  ;;  %2005 = vmatpush3.bf16.msra.mxu1 %v745_v16  ;;  %v2624_v26 = vpop.eup %2229 }
 0x2f5   : > { %2006 = vmatprep.mubr.msk.bf16.mxu1 %vm2328_vm0, %v2327_v1  ;;  %2016 = vmatprep.subr.bf16.mxu1 %v2327_v1  ;;  %v1429_v27 = vsel %vm614_vm4, %v2624_v26, 0.0 }
 0x30b   : > { %1198 = vadd.xlane.f32.xlu1 %v1197_v23 }
 0x30f   : > { %1314 = vadd.xlane.f32.xlu1 %v1313_v25 }
 0x313   : > { %1430 = vadd.xlane.f32.xlu0 %v1429_v27 }
 0x320   : > { %471 = vrot.lane.b32.xlu1 %v2505_v15, %s2341_s15 }
 0x324   : > { %481 = vrot.lane.b32.xlu1 %v2505_v15, %s2342_s16  ;;  %s2349_s16 = smov 24  }
 0x328   : > { %491 = vrot.lane.b32.xlu1 %v2505_v15, %s2343_s18  ;;  %s2350_s18 = smov 28  }
 0x34f   : > { %v735_v28 = vpop.xlane.xlu0 %734 }
 0x350   : > { %2231 = vrcp.f32 %v735_v28 }
 0x357   : > { %v851_v29 = vpop.xlane.xlu1 %850 }
 0x358   : > { %2233 = vrcp.f32 %v851_v29 }
 0x35d   : > { %v2232_v30 = vpop.eup %2231 }
 0x35e   : > { %v737_v31 = vmul.f32 %v2232_v30, %v2585_v49 }
 0x35f   : > { %v967_v32 = vpop.xlane.xlu1 %966 }
 0x360   : > { %v738_v34 = vpack.c.bf16 %v737_v31, %v737_v31  ;;  %2235 = vrcp.f32 %v967_v32 }
 0x362   : > { %2007 = vmatmul.mubr.msk.bf16.vlgmr.msra.gmra.mxu1 %vm614_vm4, %v738_v34 }
 0x363   : > { %2017 = vmatpush3.bf16.msra.mxu1 %v861_v35  ;;  %v462_v36 = vpop.permute.xlu1 %461  ;;  %2018 = vmatprep.mubr.msk.bf16.mxu1 %vm2328_vm0, %v2327_v1 }
 0x364   : > { %465 = vst.msk [vmem:[#allocation3 + $0x10] sm:$0xf] %vm417_vm2, %v462_v36  ;;  %2028 = vmatprep.subr.bf16.mxu1 %v2327_v1  ;;  %v2201_v36 = vld [vmem:[%s2790_s3 + $0x8] sm:$0xff]  }
 0x365   : > { %v2234_v15 = vpop.eup %2233  ;;  %2083 = vmatpush3.bf16.msra.mxu0 %v2201_v36 }
 0x366   : > { %v853_v37 = vmul.f32 %v2234_v15, %v2589_v54  ;;  %2084 = vmatprep.subr.bf16.mxu0 %v2327_v1 }
 0x367   : > { %v1083_v38 = vpop.xlane.xlu0 %1082 }
 0x368   : > { %v854_v39 = vpack.c.bf16 %v853_v37, %v853_v37  ;;  %2237 = vrcp.f32 %v1083_v38  ;;  %v2202_v37 = vld [vmem:[%s2790_s3] sm:$0xff]  }
 0x369   : > { %2085 = vmatpush3.bf16.msra.mxu0 %v2202_v37 }
 0x36a   : > { %2019 = vmatmul.mubr.msk.bf16.vlgmr.msra.gmra.mxu1 %vm614_vm4, %v854_v39  ;;  %2098 = vmatprep.subr.bf16.mxu0 %v2327_v1 }
 0x36b   : > { %v452_v40 = vpop.permute.xlu0 %451  ;;  %2030 = vmatprep.mubr.msk.bf16.mxu1 %vm2328_vm0, %v2327_v1  ;;  %v1088_v45 = vld [vmem:[#allocation3 + $0x10] sm:$0xf] }
 0x36c   : > { %455 = vst.msk [vmem:[#allocation3 + $0xc] sm:$0xf] %vm417_vm2, %v452_v40  ;;  %v1093_v48 = vsel %vm631_vm5, %v1088_v45, 0 }
 0x36d   : > { %v2236_v41 = vpop.eup %2235 }
 0x36e   : > { %v969_v42 = vmul.f32 %v2236_v41, %v2593_v57 }
 0x370   : > { %v970_v46 = vpack.c.bf16 %v969_v42, %v969_v42 }
 0x373   : > { %v972_v43 = vld [vmem:[#allocation3 + $0xc] sm:$0xf] }
 0x374   : > { %v977_v44 = vsel %vm631_vm5, %v972_v43, 0 }
 0x375   : > { %2029 = vmatpush3.bf16.msra.mxu1 %v977_v44  ;;  %v2238_v47 = vpop.eup %2237 }
 0x376   : > { %2040 = vmatprep.subr.bf16.mxu1 %v2327_v1  ;;  %v1085_v49 = vmul.f32 %v2238_v47, %v2597_v60 }
 0x378   : > { %2031 = vmatmul.mubr.msk.bf16.vlgmr.msra.gmra.mxu1 %vm614_vm4, %v970_v46  ;;  %v1086_v50 = vpack.c.bf16 %v1085_v49, %v1085_v49 }
 0x379   : > { %2041 = vmatpush3.bf16.msra.mxu1 %v1093_v48  ;;  %2042 = vmatprep.mubr.msk.bf16.mxu1 %vm2328_vm0, %v2327_v1 }
 0x37a   : > { %2052 = vmatprep.subr.bf16.mxu1 %v2327_v1 }
 0x380   : > { %2043 = vmatmul.mubr.msk.bf16.vlgmr.msra.gmra.mxu1 %vm614_vm4, %v1086_v50 }
 0x381   : > { %2054 = vmatprep.mubr.msk.bf16.mxu1 %vm2328_vm0, %v2327_v1 }
 0x394   : > { %v1199_v51 = vpop.xlane.xlu1 %1198 }
 0x395   : > { %2239 = vrcp.f32 %v1199_v51 }
 0x398   : > { %v1315_v52 = vpop.xlane.xlu1 %1314 }
 0x399   : > { %2241 = vrcp.f32 %v1315_v52 }
 0x39c   : > { %v472_v53 = vpop.permute.xlu1 %471  ;;  %v1431_v54 = vpop.xlane.xlu0 %1430 }
 0x39d   : > { %475 = vst.msk [vmem:[#allocation3 + $0x14] sm:$0xf] %vm417_vm2, %v472_v53  ;;  %2243 = vrcp.f32 %v1431_v54 }
 0x3a0   : > { %v482_v55 = vpop.permute.xlu1 %481 }
 0x3a1   : > { %485 = vst.msk [vmem:[#allocation3 + $0x18] sm:$0xf] %vm417_vm2, %v482_v55  ;;  %v1497_v55 = vsub.s32 1, %v2494_v8 }
 0x3a2   : > { %v2240_v56 = vpop.eup %2239 }
 0x3a3   : > { %v1201_v57 = vmul.f32 %v2240_v56, %v2616_v22  ;;  %v1498_v56 = vrot.slane %v2503_v14, %v1497_v55  ;;  %v1777_v55 = vsub.s32 6, %v2494_v8 }
 0x3a4   : > { %v492_v58 = vpop.permute.xlu1 %491  ;;  %v1204_v59 = vld [vmem:[#allocation3 + $0x14] sm:$0xf] }
 0x3a5   : > { %495 = vst.msk [vmem:[#allocation3 + $0x1c] sm:$0xf] %vm417_vm2, %v492_v58  ;;  %v1209_v60 = vsel %vm631_vm5, %v1204_v59, 0  ;;  %v1202_v61 = vpack.c.bf16 %v1201_v57, %v1201_v57 }
 0x3a6   : > { %2053 = vmatpush3.bf16.msra.mxu1 %v1209_v60  ;;  %v2242_v62 = vpop.eup %2241 }
 0x3a7   : > { %2064 = vmatprep.subr.bf16.mxu1 %v2327_v1  ;;  %v1317_v2 = vmul.f32 %v2242_v62, %v2620_v24 }
 0x3a8   : > { %v1320_v63 = vld [vmem:[#allocation3 + $0x18] sm:$0xf] }
 0x3a9   : > { %2055 = vmatmul.mubr.msk.bf16.vlgmr.msra.gmra.mxu1 %vm614_vm4, %v1202_v61  ;;  %v1325_v0 = vsel %vm631_vm5, %v1320_v63, 0  ;;  %v1318_v5 = vpack.c.bf16 %v1317_v2, %v1317_v2 }
 0x3aa   : > { %2065 = vmatpush3.bf16.msra.mxu1 %v1325_v0  ;;  %2066 = vmatprep.mubr.msk.bf16.mxu1 %vm2328_vm0, %v2327_v1  ;;  %v2244_v6 = vpop.eup %2243 }
 0x3ab   : > { %2076 = vmatprep.subr.bf16.mxu1 %v2327_v1  ;;  %v1433_v10 = vmul.f32 %v2244_v6, %v2624_v26 }
 0x3ac   : > { %v1436_v3 = vld [vmem:[#allocation3 + $0x1c] sm:$0xf] }
 0x3ad   : > { %v1441_v7 = vsel %vm631_vm5, %v1436_v3, 0  ;;  %v1434_v13 = vpack.c.bf16 %v1433_v10, %v1433_v10  ;;  %v2206_v10 = vld [vmem:[%s2792_s5 + $0x30] sm:$0xff]  }
 0x3b1   : > { %2067 = vmatmul.mubr.msk.bf16.vlgmr.msra.gmra.mxu1 %vm614_vm4, %v1318_v5 }
 0x3b2   : > { %2077 = vmatpush3.bf16.msra.mxu1 %v1441_v7  ;;  %2078 = vmatprep.mubr.msk.bf16.mxu1 %vm2328_vm0, %v2327_v1  ;;  %v2203_v7 = vld [vmem:[%s2791_s4 + $0x8] sm:$0xff]  }
 0x3b3   : > { %v669_v9 = vpop.f32.mrf.mxu1  ;;  %2090 = vmatprep.subr.bf16.mxu1 %v2327_v1 }
 0x3b4   : > { %675 = vst.msk [vmem:[#allocation4] sm:$0xff] %vm567_vm3, %v669_v9  ;;  %v2205_v9 = vld [vmem:[%s2792_s5 + $0x38] sm:$0xff]  }
 0x3b5   : > { %v1996_v11 = vpop.f32.mrf.mxu1 }
 0x3b6   : > { %v2207_v11 = vld [vmem:[%s2792_s5 + $0x28] sm:$0xff]  }
 0x3b7   : > { %v672_v12 = vpop.f32.mrf.mxu1 }
 0x3b8   : > { %v2208_v12 = vld [vmem:[%s2792_s5 + $0x20] sm:$0xff]  }
 0x3b9   : > { %v1997_v16 = vpop.f32.mrf.mxu1  ;;  %2079 = vmatmul.mubr.msk.bf16.vlgmr.msra.gmra.mxu1 %vm614_vm4, %v1434_v13  ;;  %v2209_v13 = vld [vmem:[%s2792_s5 + $0x18] sm:$0xff]  }
 0x3ba   : > { %2094 = vmatprep.mubr.msk.bf16.mxu1 %vm2328_vm0, %v2327_v1  ;;  %2091 = vmatpush3.bf16.msra.mxu1 %v2203_v7  ;;  %v2210_v16 = vld [vmem:[%s2792_s5 + $0x10] sm:$0xff]  }
 0x3bb   : > { %2092 = vmatprep.subr.bf16.mxu1 %v2327_v1 }
 0x422   : > { %v781_v17 = vpop.f32.mrf.mxu1 }
 0x423   : > { %788 = vrot.lane.b32.xlu1 %v781_v17, %s2344_s20  ;;  %s335_s20 = sand.u32 1, %s2309_s10  }
 0x424   : > { %v2008_v18 = vpop.f32.mrf.mxu1  ;;  %s1782_s15 = scalar_lea.sflag [#allocation6], %s335_s20 }
 0x426   : > { %v784_v19 = vpop.f32.mrf.mxu1 }
 0x428   : > { %v2009_v20 = vpop.f32.mrf.mxu1 }
 0x429   : > { %v1571_v20 = vsub.s32 2, %v2494_v8 }
 0x42a   : > { %v897_v21 = vpop.f32.mrf.mxu1 }
 0x42b   : > { %904 = vrot.lane.b32.xlu1 %v897_v21, %s2345_s23  ;;  %v1576_v21 = vsub.s32 3, %v2494_v8  ;;  %s1871_s23 = sshll.u32 %s335_s20, 3 }
 0x42c   : > { %v2020_v22 = vpop.f32.mrf.mxu1 }
 0x42d   : > { %v1572_v22 = vrot.slane %v2503_v14, %v1571_v20 }
 0x42e   : > { %v900_v23 = vpop.f32.mrf.mxu1 }
 0x430   : > { %v2021_v24 = vpop.f32.mrf.mxu1 }
 0x438   : > { %v1013_v25 = vpop.f32.mrf.mxu1 }
 0x439   : > { %1020 = vrot.lane.b32.xlu1 %v1013_v25, %s2346_s24  ;;  %v1577_v25 = vrot.slane %v2503_v14, %v1576_v21  ;;  %s1913_s24 = sshll.u32 %s2317_s12, 7 }
 0x43a   : > { %v2032_v26 = vpop.f32.mrf.mxu1  ;;  %s1794_s29 = scalar_lea.hbm %s2796_s9, %s1913_s24 }
 0x43c   : > { %v1016_v27 = vpop.f32.mrf.mxu1 }
 0x43e   : > { %v2033_v28 = vpop.f32.mrf.mxu1 }
 0x440   : > { %v1129_v29 = vpop.f32.mrf.mxu1 }
 0x441   : > { %1136 = vrot.lane.b32.xlu0 %v1129_v29, %s2347_s25  ;;  %v2211_v29 = vld [vmem:[%s2792_s5 + $0x8] sm:$0xff]   ;;  %s337_s25 = scalar_lea.vmem [#allocation5], %s1871_s23 }
 0x442   : > { %v2044_v30 = vpop.f32.mrf.mxu1 }
 0x443   : > { %v2212_v30 = vld [vmem:[%s2792_s5] sm:$0xff]  }
 0x444   : > { %v1132_v31 = vpop.f32.mrf.mxu1 }
 0x445   : > { %v1900_v31 = vld [vmem:[%s2794_s7] ss:$0 sm:$0xff] }
 0x446   : > { %v2045_v32 = vpop.f32.mrf.mxu1 }
 0x469   : > { %v1245_v33 = vpop.f32.mrf.mxu1 }
 0x46a   : > { %1252 = vrot.lane.b32.xlu1 %v1245_v33, %s2348_s26  ;;  %s1796_s26 = sshll.u32 %s337_s25, 4  ;;  %s1797_s26 = int_to_ptr.vmem [resolvable:$true] %s1796_s26 }
 0x46b   : > { %v2056_v34 = vpop.f32.mrf.mxu1 }
 0x46d   : > { %v1248_v35 = vpop.f32.mrf.mxu1 }
 0x46f   : > { %v2057_v15 = vpop.f32.mrf.mxu1 }
 0x471   : > { %v1361_v38 = vpop.f32.mrf.mxu1 }
 0x472   : > { %1368 = vrot.lane.b32.xlu1 %v1361_v38, %s2349_s16  ;;  %v1666_v38 = vsub.s32 4, %v2494_v8  ;;  %s2249_s16 = scalar_lea.vmem %s1797_s26, 128 }
 0x473   : > { %v2068_v39 = vpop.f32.mrf.mxu1  ;;  %p2250_p12 = scmp.ne.s32.totalorder %s1797_s26, %s2249_s16 }
 0x475   : > { %v1364_v40 = vpop.f32.mrf.mxu1  ;;  %p2251_p13 = pnand %p2250_p12, %p2442_p4 }
 0x477   : > { %v2069_v41 = vpop.f32.mrf.mxu1  ;;  %p2252_p0 = pneg %p2251_p13 }
 0x479   : > { %v1477_v42 = vpop.f32.mrf.mxu1 }
 0x47a   : > { %1484 = vrot.lane.b32.xlu1 %v1477_v42, %s2350_s18  ;;  %s2351_s18 = smov [#allocation5]  }
 0x47b   : > { %v2080_v43 = vpop.f32.mrf.mxu1  ;;  %s2253_s0 = sshll.u32 %s2351_s18, 4  ;;  %s2254_s0 = int_to_ptr.vmem [resolvable:$false] %s2253_s0 }
 0x47c   : > { %s2255_s12 = scalar_lea.vmem %s2254_s0, 256  ;;  %p2256_p1 = scmp.lt.s32.totalorder %s1797_s26, %s2254_s0 }
 0x47d   : > { %v1480_v44 = vpop.f32.mrf.mxu1  ;;  %p2257_p2 = scmp.lt.s32.totalorder %s2255_s12, %s2249_s16 }
 0x47f   : > { %v2081_v45 = vpop.f32.mrf.mxu1  ;;  %p2258_p3 = por %p2257_p2, %p2256_p1 }
 0x481   : > { %p2259_p5 = pnand %p2258_p3, %p2252_p0 }
 0x495   : > { %v789_v46 = vpop.permute.xlu1 %788 }
 0x496   : > { %792 = vst.msk [vmem:[#allocation4] sm:$0xff] %vm791_vm6, %v789_v46 }
 0x49d   : > { %v905_v47 = vpop.permute.xlu1 %904 }
 0x49e   : > { %908 = vst.msk [vmem:[#allocation4] sm:$0xff] %vm907_vm7, %v905_v47 }
 0x4ab   : > { %v1021_v48 = vpop.permute.xlu1 %1020 }
 0x4ac   : > { %1024 = vst.msk [vmem:[#allocation4] sm:$0xff] %vm1023_vm8, %v1021_v48 }
 0x4b3   : > { %v1137_v49 = vpop.permute.xlu0 %1136 }
 0x4b4   : > { %1140 = vst.msk [vmem:[#allocation4] sm:$0xff] %vm1139_vm9, %v1137_v49 }
 0x4dc   : > { %v1253_v50 = vpop.permute.xlu1 %1252 }
 0x4dd   : > { %1256 = vst.msk [vmem:[#allocation4] sm:$0xff] %vm1255_vm10, %v1253_v50 }
 0x4e4   : > { %v1369_v51 = vpop.permute.xlu1 %1368 }
 0x4e5   : > { %1372 = vst.msk [vmem:[#allocation4] sm:$0xff] %vm1371_vm11, %v1369_v51 }
 0x4ec   : > { %v1485_v52 = vpop.permute.xlu1 %1484 }
 0x4ed   : > { %1488 = vst.msk [vmem:[#allocation4] sm:$0xff] %vm1487_vm12, %v1485_v52 }
 0x4f4   : > { %v1489_v53 = vld [vmem:[#allocation4] sm:$0xff] }
 0x4f5   : > { %v1490_v54 = vpack.c.bf16 %v1489_v53, %v1489_v53 }
 0x4f7   : > { %2087 = vmatmul.mubr.msk.bf16.vlgmr.msra.gmra.mxu0 %vm372_vm1, %v1490_v54  ;;  %v1772_v54 = vsub.s32 5, %v2494_v8 }
 0x4f8   : > { %2114 = vmatprep.mubr.msk.bf16.mxu0 %vm2328_vm0, %v2327_v1  ;;  %2099 = vmatpush3.bf16.msra.mxu0 %v2205_v9 }
 0x4f9   : > { %2100 = vmatprep.subr.bf16.mxu0 %v2327_v1 }
 0x4fc   : > { %2101 = vmatpush3.bf16.msra.mxu0 %v2206_v10 }
 0x4fd   : > { %2102 = vmatprep.subr.bf16.mxu0 %v2327_v1 }
 0x500   : > { %2103 = vmatpush3.bf16.msra.mxu0 %v2207_v11 }
 0x501   : > { %2104 = vmatprep.subr.bf16.mxu0 %v2327_v1 }
 0x504   : > { %2105 = vmatpush3.bf16.msra.mxu0 %v2208_v12 }
 0x505   : > { %2106 = vmatprep.subr.bf16.mxu0 %v2327_v1 }
 0x508   : > { %2107 = vmatpush3.bf16.msra.mxu0 %v2209_v13 }
 0x509   : > { %2108 = vmatprep.subr.bf16.mxu0 %v2327_v1 }
 0x50c   : > { %2109 = vmatpush3.bf16.msra.mxu0 %v2210_v16 }
 0x50d   : > { %2110 = vmatprep.subr.bf16.mxu0 %v2327_v1 }
 0x510   : > { %2111 = vmatpush3.bf16.msra.mxu0 %v2211_v29 }
 0x511   : > { %2112 = vmatprep.subr.bf16.mxu0 %v2327_v1  ;;  %v1667_v1 = vrot.slane %v2503_v14, %v1666_v38 }
 0x514   : > { %2113 = vmatpush3.bf16.msra.mxu0 %v2212_v30 }
 0x5b7   : > { %v1548_v57 = vpop.f32.mrf.mxu0 }
 0x5b8   : > { %v1549_v58 = vadd.f32 %v1548_v57, %v1498_v56  ;;  %v1773_v56 = vrot.slane %v2503_v14, %v1772_v54 }
 0x5b9   : > { %v2088_v59 = vpop.f32.mrf.mxu0 }
 0x5ba   : > { %v1554_v60 = vadd.f32 %v1549_v58, %v2479_v4  ;;  %v2204_v4 = vld [vmem:[%s2791_s4] sm:$0xff]   ;;  %v1778_v59 = vrot.slane %v2503_v14, %v1777_v55 }
 0x5bb   : > { %v1551_v61 = vpop.f32.mrf.mxu0  ;;  %2093 = vmatpush3.bf16.msra.mxu1 %v2204_v4 }
 0x5bc   : > { %v1555_v62 = vsel %vm372_vm1, %v1554_v60, 0.0 }
 0x5bd   : > { %1556 = vadd.xlane.f32.xlu1 %v1555_v62  ;;  %v2089_v63 = vpop.f32.mrf.mxu0 }
 0x646   : > { %v1557_v0 = vpop.xlane.xlu1 %1556 }
 0x647   : > { %v1559_v2 = vmul.f32 0.03125, %v1557_v0 }
 0x649   : > { %v1560_v3 = vsub.f32 %v1554_v60, %v1559_v2 }
 0x64b   : > { %v1561_v5 = vmul.f32 %v1560_v3, %v1560_v3 }
 0x64d   : > { %v1562_v6 = vsel %vm372_vm1, %v1561_v5, 0.0 }
 0x64e   : > { %1563 = vadd.xlane.f32.xlu0 %v1562_v6 }
 0x6d7   : > { %v1564_v17 = vpop.xlane.xlu0 %1563 }
 0x6d8   : > { %v1565_v18 = vmul.f32 0.03125, %v1564_v17 }
 0x6da   : > { %v1566_v19 = vadd.f32 1e-05, %v1565_v18 }
 0x6dc   : > { %2245 = vrsqrt.f32 %v1566_v19 }
 0x6e9   : > { %v2246_v23 = vpop.eup %2245 }
 0x6ea   : > { %v1568_v24 = vmul.f32 %v2246_v23, %v1560_v3 }
 0x6ec   : > { %v1573_v26 = vmul.f32 %v1572_v22, %v1568_v24 }
 0x6ee   : > { %v1578_v27 = vadd.f32 %v1577_v25, %v1573_v26 }
 0x6f0   : > { %v1579_v28 = vpack.c.bf16 %v1578_v27, %v1578_v27 }
 0x6f2   : > { %2095 = vmatmul.mubr.msk.bf16.vlgmr.msra.gmra.mxu1 %vm372_vm1, %v1579_v28 }
 0x7b2   : > { %v1640_v32 = vpop.f32.mrf.mxu1 }
 0x7b3   : > { %v1641_v33 = vadd.f32 %v1900_v31, %v1640_v32 }
 0x7b4   : > { %v2096_v34 = vpop.f32.mrf.mxu1 }
 0x7b5   : > { %v1646_v35 = vmax.f32 %v1641_v33, 0.0 }
 0x7b6   : > { %v1643_v36 = vpop.f32.mrf.mxu1 }
 0x7b7   : > { %v1647_v15 = vpack.c.bf16 %v1646_v35, %v1646_v35 }
 0x7b8   : > { %v2097_v37 = vpop.f32.mrf.mxu1 }
 0x7b9   : > { %2115 = vmatmul.mubr.bf16.vlgmr.msra.gmra.mxu0 %v1647_v15 }
 0x879   : > { %v1750_v39 = vpop.f32.mrf.mxu0 }
 0x87a   : > { %v1751_v40 = vadd.f32 %v1750_v39, %v1667_v1 }
 0x87b   : > { %v2116_v41 = vpop.f32.mrf.mxu0 }
 0x87c   : > { %v1756_v42 = vadd.f32 %v1751_v40, %v1578_v27 }
 0x87d   : > { %v1753_v43 = vpop.f32.mrf.mxu0 }
 0x87e   : > { %v1757_v44 = vsel %vm372_vm1, %v1756_v42, 0.0 }
 0x87f   : > { %1758 = vadd.xlane.f32.xlu1 %v1757_v44  ;;  %v2117_v45 = vpop.f32.mrf.mxu0 }
 0x908   : > { %v1759_v46 = vpop.xlane.xlu1 %1758 }
 0x909   : > { %v1760_v47 = vmul.f32 0.03125, %v1759_v46 }
 0x90b   : > { %v1761_v48 = vsub.f32 %v1756_v42, %v1760_v47 }
 0x90d   : > { %v1762_v49 = vmul.f32 %v1761_v48, %v1761_v48 }
 0x90f   : > { %v1763_v50 = vsel %vm372_vm1, %v1762_v49, 0.0 }
 0x910   : > { %1764 = vadd.xlane.f32.xlu0 %v1763_v50 }
 0x999   : > { %v1765_v51 = vpop.xlane.xlu0 %1764 }
 0x99a   : > { %v1766_v52 = vmul.f32 0.03125, %v1765_v51 }
 0x99c   : > { %v1767_v53 = vadd.f32 1e-05, %v1766_v52 }
 0x99e   : > { %2247 = vrsqrt.f32 %v1767_v53 }
 0x9ab   : > { %v2248_v57 = vpop.eup %2247 }
 0x9ac   : > { %v1769_v58 = vmul.f32 %v2248_v57, %v1761_v48 }
 0x9ae   : > { %v1774_v60 = vmul.f32 %v1773_v56, %v1769_v58 }
 0x9b0   : > { %v1779_v61 = vadd.f32 %v1778_v59, %v1774_v60 }
 0x9b2   : > { %1780 = vst.msk [vmem:[%s337_s25] sm:$0xff] %vm372_vm1, %v1779_v61 }
 0x9b3   : > { %2262 = shalt.err (!%p2259_p5)
}
 0x9b4   : > { %s2263_s23 = scalar_lea.hbm %s1794_s29, 128  ;;  %s2267_s25 = scalar_lea.hbm %s2796_s9, 256 }
 0x9b5   : > { %p2264_p6 = scmp.ne.s32.totalorder %s1794_s29, %s2263_s23  ;;  %p2268_p10 = scmp.lt.s32.totalorder %s1794_s29, %s2796_s9 }
 0x9b6   : > { %p2269_p11 = scmp.lt.s32.totalorder %s2267_s25, %s2263_s23 }
 0x9b7   : > { %p2265_p7 = pnand %p2264_p6, %p2442_p4 }
 0x9b8   : > { %p2270_p12 = por %p2269_p11, %p2268_p10 }
 0x9b9   : > { %p2266_p9 = pneg %p2265_p7 }
 0x9bb   : > { %p2271_p13 = pnand %p2270_p12, %p2266_p9 }
 0x9bd   : > { %2274 = shalt.err (!%p2271_p13)
}
 0x9be   : > { %2118 = dma.vmem_to_hbm [thread:$0]  (%p2442_p4), %s1797_s26, 128, %s1794_s29, %s1782_s15  }
 0x9bf PF: > { %p2124_p0 = scmp.ge.s32.totalorder %s2325_s14, 2  ;;  %s1808_s0 = sand.u32 1, %s2305_s30  }
 0x9c0   : > { %s1809_s16 = scalar_lea.sflag [#allocation6], %s1808_s0 }
 0x9c1   : > { %p2121_p1 = pnand %p2124_p0, %p2449_p8 }
 0x9c3   : > { %p2122_p2 = pneg %p2121_p1 }
 0x9c5   : > { %2300 = dma.done.wait (%p2122_p2), %s1809_s16, 128  }
 0x9c6   : > { %2302 = vsyncadd (%p2122_p2), %s1809_s16, 4294967168  ;;  %s22_s14 = sadd.s32 1, %s2325_s14   ;;  %s2801_s30 = smov %s2309_s10 }
 0x9c7   : > { %p19_p3 = scmp.ge.s32.totalorder %s22_s14, 4   ;;  %s2802_s10 = smov %s2313_s11 }
 0x9c8   : > { %s2803_s11 = smov %s2455_s22  ;;  %s2804_s12 = smov %s2321_s13 }
 0x9c9   : > { %s2805_s13 = smov %s2807_s17  ;;  %21 = sbr.rel (!%p19_p3) target bundleno = 6 (0x6), region = 124 }
 0x9ce   :  { %1814 = vsyncpa [#allocation6], 1 }
 0x9cf   :  { %1816 = vsyncpa [#allocation6 + $0x1], 1 }

</bundles_post_ra>
